<compile_context>
chip_gen: v5e
topology: v5e:2x2
jax: 0.10.0
libtpu: 0.0.40
codegen_flags: <defaults>
</compile_context>

<pallas_src>
import numpy as np
import jax
import jax.numpy as jnp
from jax import lax
from jax.experimental import pallas as pl
from jax.experimental.pallas import tpu as pltpu

N_LAYERS = 2  # decoder n_layers (MinusGate depth for gf/gs/gc)


# --------------------------------------------------------------------------- slab layout
def _weight_entries(L):
    """Ordered (group, key, layer, k_mult): each entry occupies k_mult*H rows of the weight slab."""
    ents = [("gr", "wi", None, 3)]
    for g in ("gf", "gs", "gc"):
        ents.append((g, "wi", None, 2))
        for l in range(L):
            ents.append((g, "wc", l, 2))
            ents.append((g, "wz", l, 3))
    for g in ("fed", "sel", "attn"):
        ents.append((g, "w", None, 2))
    return ents


def _bias_entries(L):
    """Ordered (group, key, layer): each entry is one (1, H) row of the bias/gain slab."""
    ents = [("gr", "bi", None), ("gr", "og", None), ("gr", "ob", None)]
    for g in ("gf", "gs", "gc"):
        ents.append((g, "bi", None))
        for l in range(L):
            ents += [(g, "bc", l), (g, "bz", l), (g, "ng", l), (g, "nb", l)]
        ents += [(g, "og", None), (g, "ob", None)]
    for g in ("fed", "sel", "attn"):
        ents += [(g, "b", None), (g, "v", None)]
    return ents


def pack_params(params, H, n_layers=N_LAYERS):
    """One-time packing of all parameters into two contiguous slabs (outside the decode loop)."""
    ws, bs = [], []
    for g, k, l, m in _weight_entries(n_layers):
        w = params[g][k] if l is None else params[g][k][l]
        ws.append(jnp.asarray(w, jnp.float32).reshape(m * H, H))
    for g, k, l in _bias_entries(n_layers):
        v = params[g][k] if l is None else params[g][k][l]
        bs.append(jnp.asarray(v, jnp.float32).reshape(1, H))
    return {"w": jnp.concatenate(ws, axis=0), "b": jnp.concatenate(bs, axis=0)}


# --------------------------------------------------------------------------- small helpers
def _ln(x, g, b):
    """PyTorch-style LayerNorm over the last axis (eps=1e-5)."""
    mu = jnp.mean(x, axis=-1, keepdims=True)
    var = jnp.mean(jnp.square(x - mu), axis=-1, keepdims=True)
    return (x - mu) * lax.rsqrt(var + 1e-5) * g + b


def _rep_T(nrep, B):
    """(B, nrep*B) f32 matrix with [b, i] = 1 iff i % B == b, built in-kernel (no HBM traffic)."""
    r = lax.broadcasted_iota(jnp.int32, (B, B), 0)
    c = lax.broadcasted_iota(jnp.int32, (B, B), 1)
    eye = (r == c).astype(jnp.float32)
    return jnp.concatenate([eye] * nrep, axis=1)


# --------------------------------------------------------------------------- fused decoder kernel
def _make_decoder_kernel(H, F, S, L, B, V):
    FB, SB = F * B, S * B

    # static row offsets into the packed slabs (shared layout with pack_params)
    w_off, off = {}, 0
    for g, k, l, m in _weight_entries(L):
        w_off[(g, k, l)] = (off, m * H)
        off += m * H
    b_idx = {e: i for i, e in enumerate(_bias_entries(L))}

    def kernel(ids_ref, wdv_ref, out0_ref, fh_ref, enc_ref, msk_ref,
               w_ref, b_ref, out_ref, hid_ref):

        def W(g, k, l=None):
            o, n = w_off[(g, k, l)]
            return w_ref[o:o + n, :]                    # static, sublane-aligned slice

        def Bv(g, k, l=None):
            i = b_idx[(g, k, l)]
            return b_ref[i:i + 1, :]                    # (1, H)

        def dot(a, b):
            return jnp.dot(a, b, preferred_element_type=jnp.float32)

        relu = lambda x: jnp.maximum(x, 0.0)

        fh = fh_ref[...]                                # (FB, H)  original feed_hidden
        enc = enc_ref[...]                              # (SB, H)
        fh0 = fh[0:B]                                   # (B, H)   feed_hidden[0]
        out0 = out0_ref[...]                            # (B, H)

        # ---- fused embedding gather: last_emb[b] = word_dict_vec[b, input_ids[b]] ----
        last_emb = jnp.concatenate(
            [wdv_ref[pl.ds(b * V + ids_ref[b], 1), :] for b in range(B)], axis=0)  # (B, H)

        # ---- gr : MinusGate(H, stuff=3, L=0) on cat([fh0, output, last_emb], -1) ----
        x_r = jnp.concatenate([fh0, out0, last_emb], axis=-1)                       # (B, 3H)
        solution = _ln(relu(dot(x_r, W("gr", "wi")) + Bv("gr", "bi")),
                       Bv("gr", "og"), Bv("gr", "ob"))                              # (B, H)
        sol_rep = jnp.concatenate([solution] * F, axis=0)                           # (FB, H)

        # ---- generic MinusGate(stuff=2, L) on [a | b]; input[0] = a ----
        def minus2(a, b, grp):
            ab = jnp.concatenate([a, b], axis=-1)                                   # (N, 2H)
            f = relu(dot(ab, W(grp, "wi")) + Bv(grp, "bi"))
            for l in range(L):
                t = _ln(f, Bv(grp, "ng", l), Bv(grp, "nb", l))
                c = relu(dot(ab, W(grp, "wc", l)) + Bv(grp, "bc", l))
                ctz = jnp.concatenate([c, t, a], axis=-1)                           # (N, 3H)
                z = relu(dot(ctz, W(grp, "wz", l)) + Bv(grp, "bz", l))
                f = f - c * z
            return _ln(f, Bv(grp, "og"), Bv(grp, "ob"))

        # ---- gf : feedback = MinusGate([feed_hidden, solution]) ----
        feedback = minus2(fh, sol_rep, "gf")                                        # (FB, H)

        # ---- fed : UpdateGate(solution, feed_hidden) + blend ----
        hx = jnp.concatenate([sol_rep, fh], axis=-1)                                # (FB, 2H)
        e_f = relu(dot(hx, W("fed", "w")) + Bv("fed", "b"))
        gate = jax.nn.sigmoid(jnp.sum(e_f * Bv("fed", "v"), axis=-1, keepdims=True))
        fh_new = (1.0 - gate) * fh + gate * feedback                                # (FB, H)

        # ---- gs : values = MinusGate([solution, feed_hidden_new]) ----
        values = minus2(sol_rep, fh_new, "gs")                                      # (FB, H)

        # ---- sel attention over F (no mask) + weighted sum of `values` ----
        sx = jnp.concatenate([sol_rep, fh_new], axis=-1)
        s1 = jnp.tanh(dot(sx, W("sel", "w")) + Bv("sel", "b"))
        e1 = jnp.sum(s1 * Bv("sel", "v"), axis=-1, keepdims=True)                   # (FB, 1)
        p1 = jnp.exp(e1 - jnp.max(e1, axis=0, keepdims=True))    # global max: softmax-invariant here
        r_ft = _rep_T(F, B)                                                         # (B, FB)
        num1 = dot(r_ft, p1 * values)                                               # (B, H)
        den1 = dot(r_ft, p1)                                                        # (B, 1)
        new_hidden = num1 / den1                                                    # exact division

        # ---- encoder attention over S (masked) -> context ----
        nh_rep = jnp.concatenate([new_hidden] * S, axis=0)                          # (SB, H)
        ax = jnp.concatenate([nh_rep, enc], axis=-1)                                # (SB, 2H)
        s2 = jnp.tanh(dot(ax, W("attn", "w")) + Bv("attn", "b"))
        e2 = jnp.sum(s2 * Bv("attn", "v"), axis=-1, keepdims=True)                  # (SB, 1)
        e2 = jnp.where(msk_ref[...] > 0.5, -1e12, e2)                               # masked_fill_
        p2 = jnp.exp(e2 - jnp.max(e2, axis=0, keepdims=True))
        r_st = _rep_T(S, B)                                                         # (B, SB)
        num2 = dot(r_st, p2 * enc)
        den2 = dot(r_st, p2)
        context = num2 / den2                                                       # (B, H)

        # ---- gc : final output + merged hidden slab ----
        out_ref[...] = minus2(new_hidden, context, "gc")                            # (B, H)
        hid_ref[...] = jnp.concatenate([fh_new, new_hidden], axis=0)                # ((F+1)*B, H)

    return kernel


# --------------------------------------------------------------------------- wrapper
def decoder_pallas(packed, input_ids, feed_hidden, output, word_dict_vec,
                   encoder_outputs, seq_mask, n_layers=N_LAYERS):
    F, B, H = feed_hidden.shape
    S = encoder_outputs.shape[0]
    V = word_dict_vec.shape[1]

    fh_flat = feed_hidden.reshape(F * B, H)              # row = f*B + b
    enc_flat = encoder_outputs.reshape(S * B, H)         # row = s*B + b
    wdv_flat = word_dict_vec.reshape(B * V, H)           # row = b*V + v
    # TODO(synk): in a real decode loop this mask prep is step-invariant -> hoist it.
    mask_flat = jnp.transpose(seq_mask).astype(jnp.float32).reshape(S * B, 1)

    vmem = pl.BlockSpec(memory_space=pltpu.MemorySpace.VMEM)
    smem = pl.BlockSpec(memory_space=pltpu.MemorySpace.SMEM)

    out, hid = pl.pallas_call(
        _make_decoder_kernel(H, F, S, n_layers, B, V),
        out_shape=(jax.ShapeDtypeStruct((B, H), jnp.float32),
                   jax.ShapeDtypeStruct(((F + 1) * B, H), jnp.float32)),
        in_specs=[smem, vmem, vmem, vmem, vmem, vmem, vmem, vmem],
        out_specs=(vmem, vmem),
    )(input_ids.astype(jnp.int32), wdv_flat, output, fh_flat, enc_flat,
      mask_flat, packed["w"], packed["b"])

    return out, hid.reshape(F + 1, B, H)                 # ((B,H), (F+1,B,H))


# --------------------------------------------------------------------------- pure-JAX reference (mirrors the PyTorch code)
def minusgate_ref(p, inputs, L):
    x = jnp.concatenate(inputs, -1)
    x0 = inputs[0]
    f = jax.nn.relu(x @ p["wi"] + p["bi"])
    for l in range(L):
        t = _ln(f, p["ng"][l], p["nb"][l])
        c = jax.nn.relu(x @ p["wc"][l] + p["bc"][l])
        z = jax.nn.relu(jnp.concatenate([c, t, x0], -1) @ p["wz"][l] + p["bz"][l])
        f = f - c * z
    return _ln(f, p["og"], p["ob"])


def attn_ref(p, hidden, enc, mask=None):
    Lx, B, H = enc.shape
    hid = jnp.broadcast_to(hidden[None], (Lx, B, H))
    x = jnp.concatenate([hid, enc], axis=-1)
    e = jnp.sum(jnp.tanh(x @ p["w"] + p["b"]) * p["v"], -1).T          # (B, Lx)
    if mask is not None:
        e = jnp.where(mask, -1e12, e)
    return jax.nn.softmax(e, axis=1)


def fed_ref(p, hidden, enc):
    Lx, B, H = enc.shape
    hid = jnp.broadcast_to(hidden, (Lx, B, H))
    x = jnp.concatenate([hid, enc], axis=-1)
    e = jax.nn.relu(x @ p["w"] + p["b"])
    return jax.nn.sigmoid(jnp.sum(e * p["v"], -1, keepdims=True))


def decoder_ref(params, input_ids, feed_hidden, output, word_dict_vec,
                encoder_outputs, seq_mask, n_layers=N_LAYERS):
    F, B, H = feed_hidden.shape
    one_hot = jax.nn.one_hot(input_ids, word_dict_vec.shape[1], dtype=jnp.float32)
    last_emb = jnp.einsum("bv,bvh->bh", one_hot, word_dict_vec)[None]   # (1,B,H)
    solution = minusgate_ref(params["gr"], [feed_hidden[:1], output[None], last_emb], 0)
    temp = jnp.broadcast_to(solution, (F, B, H))
    feedback = minusgate_ref(params["gf"], [feed_hidden, temp], n_layers)
    gate = fed_ref(params["fed"], solution, feed_hidden)
    feed_hidden = (1 - gate) * feed_hidden + gate * feedback
    temp = jnp.broadcast_to(solution, (F, B, H))
    values = minusgate_ref(params["gs"], [temp, feed_hidden], n_layers)
    w1 = attn_ref(params["sel"], solution[0], feed_hidden)              # (B,F)
    new_hidden = jnp.einsum("bf,fbh->bh", w1, values)[None]
    w2 = attn_ref(params["attn"], new_hidden[0], encoder_outputs, seq_mask)
    context = jnp.einsum("bs,sbh->bh", w2, encoder_outputs)[None]
    out = minusgate_ref(params["gc"], [new_hidden, context], n_layers)
    return out[0], jnp.concatenate([feed_hidden, new_hidden], axis=0)


# --------------------------------------------------------------------------- deterministic parameter init
def init_params(key, H):
    keys = iter(jax.random.split(key, 64))

    def lin(i, o):
        return 0.1 * jax.random.normal(next(keys), (i, o), jnp.float32)

    def vec(o):
        return 0.1 * jax.random.normal(next(keys), (1, o), jnp.float32)

    def minus(stuff, L):
        p = {"wi": lin(stuff * H, H), "bi": vec(H),
             "og": jnp.ones((1, H), jnp.float32), "ob": jnp.zeros((1, H), jnp.float32)}
        if L > 0:
            p["wc"] = jnp.stack([lin(stuff * H, H) for _ in range(L)])
            p["bc"] = jnp.stack([vec(H) for _ in range(L)])
            p["wz"] = jnp.stack([lin(3 * H, H) for _ in range(L)])
            p["bz"] = jnp.stack([vec(H) for _ in range(L)])
            p["ng"] = jnp.ones((L, 1, H), jnp.float32)
            p["nb"] = jnp.zeros((L, 1, H), jnp.float32)
        return p

    def attn_like():
        return {"w": lin(2 * H, H), "b": vec(H), "v": vec(H)}

    return {"gr": minus(3, 0), "gf": minus(2, N_LAYERS), "gs": minus(2, N_LAYERS),
            "gc": minus(2, N_LAYERS), "attn": attn_like(), "fed": attn_like(),
            "sel": attn_like()}


# --------------------------------------------------------------------------- main
if __name__ == "__main__":
    H, B, F, S, V = 32, 2, 3, 8, 16
    key = jax.random.PRNGKey(0)
    kp, k1, k2, k3, k4, k5, k6 = jax.random.split(key, 7)
    params = init_params(kp, H)
    packed = pack_params(params, H)          # one-time packing, outside any decode loop

    input_ids = jax.random.randint(k1, (B,), 0, V)
    feed_hidden = jax.random.normal(k2, (F, B, H), jnp.float32)
    output = jax.random.normal(k3, (B, H), jnp.float32)
    word_dict_vec = jax.random.normal(k4, (B, V, H), jnp.float32)
    encoder_outputs = jax.random.normal(k5, (S, B, H), jnp.float32)
    seq_mask = jax.random.bernoulli(k6, 0.25, (B, S))

    out_p, fh_p = jax.jit(decoder_pallas)(packed, input_ids, feed_hidden, output,
                                          word_dict_vec, encoder_outputs, seq_mask)
    jax.block_until_ready((out_p, fh_p))

    out_r, fh_r = decoder_ref(params, input_ids, feed_hidden, output,
                              word_dict_vec, encoder_outputs, seq_mask)
    np.testing.assert_allclose(np.asarray(out_p), np.asarray(out_r), rtol=1e-2, atol=1e-3)
    np.testing.assert_allclose(np.asarray(fh_p), np.asarray(fh_r), rtol=1e-2, atol=1e-3)
    print("KERNEL_OK")
</pallas_src>

<mosaic_0001>
module attributes {stable_mosaic.version = 11 : i64} {
  func.func @kernel(%arg0: memref<2xi32, #tpu.memory_space<smem>>, %arg1: memref<32x32xf32, #tpu.memory_space<vmem>>, %arg2: memref<2x32xf32, #tpu.memory_space<vmem>>, %arg3: memref<6x32xf32, #tpu.memory_space<vmem>>, %arg4: memref<16x32xf32, #tpu.memory_space<vmem>>, %arg5: memref<16x1xf32, #tpu.memory_space<vmem>>, %arg6: memref<1440x32xf32, #tpu.memory_space<vmem>>, %arg7: memref<42x32xf32, #tpu.memory_space<vmem>>, %arg8: memref<2x32xf32, #tpu.memory_space<vmem>>, %arg9: memref<8x32xf32, #tpu.memory_space<vmem>>) attributes {dimension_semantics = [], scalar_prefetch = 0 : i64, scratch_operands = 0 : i64, tpu.core_type = #tpu.core_type<tc>} {
    %c0 = arith.constant 0 : index
    %c0_0 = arith.constant 0 : index
    %0 = vector.load %arg3[%c0, %c0_0] : memref<6x32xf32, #tpu.memory_space<vmem>>, vector<6x32xf32>
    %c0_1 = arith.constant 0 : index
    %c0_2 = arith.constant 0 : index
    %1 = vector.load %arg4[%c0_1, %c0_2] : memref<16x32xf32, #tpu.memory_space<vmem>>, vector<16x32xf32>
    %2 = vector.extract_strided_slice %0 {offsets = [0, 0], sizes = [2, 32], strides = [1, 1]} : vector<6x32xf32> to vector<2x32xf32>
    %c0_3 = arith.constant 0 : index
    %c0_4 = arith.constant 0 : index
    %3 = vector.load %arg2[%c0_3, %c0_4] : memref<2x32xf32, #tpu.memory_space<vmem>>, vector<2x32xf32>
    %c0_5 = arith.constant 0 : index
    %4 = memref.load %arg0[%c0_5] : memref<2xi32, #tpu.memory_space<smem>>
    %c0_i32 = arith.constant 0 : i32
    %5 = arith.addi %c0_i32, %4 : i32
    %6 = arith.index_cast %5 : i32 to index
    %c0_6 = arith.constant 0 : index
    %7 = vector.load %arg1[%6, %c0_6] : memref<32x32xf32, #tpu.memory_space<vmem>>, vector<1x32xf32>
    %c1 = arith.constant 1 : index
    %8 = memref.load %arg0[%c1] : memref<2xi32, #tpu.memory_space<smem>>
    %c16_i32 = arith.constant 16 : i32
    %9 = arith.addi %c16_i32, %8 : i32
    %10 = arith.index_cast %9 : i32 to index
    %c0_7 = arith.constant 0 : index
    %11 = vector.load %arg1[%10, %c0_7] : memref<32x32xf32, #tpu.memory_space<vmem>>, vector<1x32xf32>
    %12 = tpu.concatenate %7, %11 in 0 : vector<1x32xf32>, vector<1x32xf32> -> vector<2x32xf32>
    %13 = tpu.concatenate %2, %3, %12 in 1 : vector<2x32xf32>, vector<2x32xf32>, vector<2x32xf32> -> vector<2x96xf32>
    %c0_8 = arith.constant 0 : index
    %c0_9 = arith.constant 0 : index
    %14 = vector.load %arg6[%c0_8, %c0_9] : memref<1440x32xf32, #tpu.memory_space<vmem>>, vector<96x32xf32>
    %cst = arith.constant dense<0.000000e+00> : vector<2x32xf32>
    %15 = tpu.matmul %13, %14, %cst {dimension_numbers = #tpu.dot_dimension_numbers<[1], [0], [0], [1], [0, 0, 1, 1], [], []>} : vector<2x96xf32>, vector<96x32xf32>, vector<2x32xf32> -> vector<2x32xf32>
    %c0_10 = arith.constant 0 : index
    %c0_11 = arith.constant 0 : index
    %16 = vector.load %arg7[%c0_10, %c0_11] : memref<42x32xf32, #tpu.memory_space<vmem>>, vector<1x32xf32>
    %17 = vector.broadcast %16 : vector<1x32xf32> to vector<2x32xf32>
    %18 = arith.addf %15, %17 : vector<2x32xf32>
    %cst_12 = arith.constant 0.000000e+00 : f32
    %19 = vector.broadcast %cst_12 : f32 to vector<2x32xf32>
    %20 = arith.maximumf %18, %19 : vector<2x32xf32>
    %c1_13 = arith.constant 1 : index
    %c0_14 = arith.constant 0 : index
    %21 = vector.load %arg7[%c1_13, %c0_14] : memref<42x32xf32, #tpu.memory_space<vmem>>, vector<1x32xf32>
    %c2 = arith.constant 2 : index
    %c0_15 = arith.constant 0 : index
    %22 = vector.load %arg7[%c2, %c0_15] : memref<42x32xf32, #tpu.memory_space<vmem>>, vector<1x32xf32>
    %cst_16 = arith.constant dense<0.000000e+00> : vector<2xf32>
    %23 = vector.multi_reduction <add>, %20, %cst_16 [1] : vector<2x32xf32> to vector<2xf32>
    %24 = vector.shape_cast %23 : vector<2xf32> to vector<2x1xf32>
    %cst_17 = arith.constant 3.200000e+01 : f32
    %25 = vector.broadcast %cst_17 : f32 to vector<2x1xf32>
    %26 = arith.divf %24, %25 : vector<2x1xf32>
    %27 = vector.broadcast %26 : vector<2x1xf32> to vector<2x32xf32>
    %28 = arith.subf %20, %27 : vector<2x32xf32>
    %29 = arith.mulf %28, %28 : vector<2x32xf32>
    %cst_18 = arith.constant dense<0.000000e+00> : vector<2xf32>
    %30 = vector.multi_reduction <add>, %29, %cst_18 [1] : vector<2x32xf32> to vector<2xf32>
    %31 = vector.shape_cast %30 : vector<2xf32> to vector<2x1xf32>
    %cst_19 = arith.constant 3.200000e+01 : f32
    %32 = vector.broadcast %cst_19 : f32 to vector<2x1xf32>
    %33 = arith.divf %31, %32 : vector<2x1xf32>
    %34 = vector.broadcast %26 : vector<2x1xf32> to vector<2x32xf32>
    %35 = arith.subf %20, %34 : vector<2x32xf32>
    %cst_20 = arith.constant 9.99999974E-6 : f32
    %36 = vector.broadcast %cst_20 : f32 to vector<2x1xf32>
    %37 = arith.addf %33, %36 : vector<2x1xf32>
    %38 = math.rsqrt %37 : vector<2x1xf32>
    %39 = vector.broadcast %38 : vector<2x1xf32> to vector<2x32xf32>
    %40 = arith.mulf %35, %39 : vector<2x32xf32>
    %41 = vector.broadcast %21 : vector<1x32xf32> to vector<2x32xf32>
    %42 = arith.mulf %40, %41 : vector<2x32xf32>
    %43 = vector.broadcast %22 : vector<1x32xf32> to vector<2x32xf32>
    %44 = arith.addf %42, %43 : vector<2x32xf32>
    %45 = tpu.concatenate %44, %44, %44 in 0 : vector<2x32xf32>, vector<2x32xf32>, vector<2x32xf32> -> vector<6x32xf32>
    %46 = tpu.concatenate %0, %45 in 1 : vector<6x32xf32>, vector<6x32xf32> -> vector<6x64xf32>
    %c96 = arith.constant 96 : index
    %c0_21 = arith.constant 0 : index
    %47 = vector.load %arg6[%c96, %c0_21] : memref<1440x32xf32, #tpu.memory_space<vmem>>, vector<64x32xf32>
    %cst_22 = arith.constant dense<0.000000e+00> : vector<6x32xf32>
    %48 = tpu.matmul %46, %47, %cst_22 {dimension_numbers = #tpu.dot_dimension_numbers<[1], [0], [0], [1], [0, 0, 1, 1], [], []>} : vector<6x64xf32>, vector<64x32xf32>, vector<6x32xf32> -> vector<6x32xf32>
    %c3 = arith.constant 3 : index
    %c0_23 = arith.constant 0 : index
    %49 = vector.load %arg7[%c3, %c0_23] : memref<42x32xf32, #tpu.memory_space<vmem>>, vector<1x32xf32>
    %50 = vector.broadcast %49 : vector<1x32xf32> to vector<6x32xf32>
    %51 = arith.addf %48, %50 : vector<6x32xf32>
    %cst_24 = arith.constant 0.000000e+00 : f32
    %52 = vector.broadcast %cst_24 : f32 to vector<6x32xf32>
    %53 = arith.maximumf %51, %52 : vector<6x32xf32>
    %c6 = arith.constant 6 : index
    %c0_25 = arith.constant 0 : index
    %54 = vector.load %arg7[%c6, %c0_25] : memref<42x32xf32, #tpu.memory_space<vmem>>, vector<1x32xf32>
    %c7 = arith.constant 7 : index
    %c0_26 = arith.constant 0 : index
    %55 = vector.load %arg7[%c7, %c0_26] : memref<42x32xf32, #tpu.memory_space<vmem>>, vector<1x32xf32>
    %cst_27 = arith.constant dense<0.000000e+00> : vector<6xf32>
    %56 = vector.multi_reduction <add>, %53, %cst_27 [1] : vector<6x32xf32> to vector<6xf32>
    %57 = vector.shape_cast %56 : vector<6xf32> to vector<6x1xf32>
    %cst_28 = arith.constant 3.200000e+01 : f32
    %58 = vector.broadcast %cst_28 : f32 to vector<6x1xf32>
    %59 = arith.divf %57, %58 : vector<6x1xf32>
    %60 = vector.broadcast %59 : vector<6x1xf32> to vector<6x32xf32>
    %61 = arith.subf %53, %60 : vector<6x32xf32>
    %62 = arith.mulf %61, %61 : vector<6x32xf32>
    %cst_29 = arith.constant dense<0.000000e+00> : vector<6xf32>
    %63 = vector.multi_reduction <add>, %62, %cst_29 [1] : vector<6x32xf32> to vector<6xf32>
    %64 = vector.shape_cast %63 : vector<6xf32> to vector<6x1xf32>
    %cst_30 = arith.constant 3.200000e+01 : f32
    %65 = vector.broadcast %cst_30 : f32 to vector<6x1xf32>
    %66 = arith.divf %64, %65 : vector<6x1xf32>
    %67 = vector.broadcast %59 : vector<6x1xf32> to vector<6x32xf32>
    %68 = arith.subf %53, %67 : vector<6x32xf32>
    %cst_31 = arith.constant 9.99999974E-6 : f32
    %69 = vector.broadcast %cst_31 : f32 to vector<6x1xf32>
    %70 = arith.addf %66, %69 : vector<6x1xf32>
    %71 = math.rsqrt %70 : vector<6x1xf32>
    %72 = vector.broadcast %71 : vector<6x1xf32> to vector<6x32xf32>
    %73 = arith.mulf %68, %72 : vector<6x32xf32>
    %74 = vector.broadcast %54 : vector<1x32xf32> to vector<6x32xf32>
    %75 = arith.mulf %73, %74 : vector<6x32xf32>
    %76 = vector.broadcast %55 : vector<1x32xf32> to vector<6x32xf32>
    %77 = arith.addf %75, %76 : vector<6x32xf32>
    %c160 = arith.constant 160 : index
    %c0_32 = arith.constant 0 : index
    %78 = vector.load %arg6[%c160, %c0_32] : memref<1440x32xf32, #tpu.memory_space<vmem>>, vector<64x32xf32>
    %cst_33 = arith.constant dense<0.000000e+00> : vector<6x32xf32>
    %79 = tpu.matmul %46, %78, %cst_33 {dimension_numbers = #tpu.dot_dimension_numbers<[1], [0], [0], [1], [0, 0, 1, 1], [], []>} : vector<6x64xf32>, vector<64x32xf32>, vector<6x32xf32> -> vector<6x32xf32>
    %c4 = arith.constant 4 : index
    %c0_34 = arith.constant 0 : index
    %80 = vector.load %arg7[%c4, %c0_34] : memref<42x32xf32, #tpu.memory_space<vmem>>, vector<1x32xf32>
    %81 = vector.broadcast %80 : vector<1x32xf32> to vector<6x32xf32>
    %82 = arith.addf %79, %81 : vector<6x32xf32>
    %cst_35 = arith.constant 0.000000e+00 : f32
    %83 = vector.broadcast %cst_35 : f32 to vector<6x32xf32>
    %84 = arith.maximumf %82, %83 : vector<6x32xf32>
    %85 = tpu.concatenate %84, %77, %0 in 1 : vector<6x32xf32>, vector<6x32xf32>, vector<6x32xf32> -> vector<6x96xf32>
    %c224 = arith.constant 224 : index
    %c0_36 = arith.constant 0 : index
    %86 = vector.load %arg6[%c224, %c0_36] : memref<1440x32xf32, #tpu.memory_space<vmem>>, vector<96x32xf32>
    %cst_37 = arith.constant dense<0.000000e+00> : vector<6x32xf32>
    %87 = tpu.matmul %85, %86, %cst_37 {dimension_numbers = #tpu.dot_dimension_numbers<[1], [0], [0], [1], [0, 0, 1, 1], [], []>} : vector<6x96xf32>, vector<96x32xf32>, vector<6x32xf32> -> vector<6x32xf32>
    %c5 = arith.constant 5 : index
    %c0_38 = arith.constant 0 : index
    %88 = vector.load %arg7[%c5, %c0_38] : memref<42x32xf32, #tpu.memory_space<vmem>>, vector<1x32xf32>
    %89 = vector.broadcast %88 : vector<1x32xf32> to vector<6x32xf32>
    %90 = arith.addf %87, %89 : vector<6x32xf32>
    %cst_39 = arith.constant 0.000000e+00 : f32
    %91 = vector.broadcast %cst_39 : f32 to vector<6x32xf32>
    %92 = arith.maximumf %90, %91 : vector<6x32xf32>
    %93 = arith.mulf %84, %92 : vector<6x32xf32>
    %94 = arith.subf %53, %93 : vector<6x32xf32>
    %c10 = arith.constant 10 : index
    %c0_40 = arith.constant 0 : index
    %95 = vector.load %arg7[%c10, %c0_40] : memref<42x32xf32, #tpu.memory_space<vmem>>, vector<1x32xf32>
    %c11 = arith.constant 11 : index
    %c0_41 = arith.constant 0 : index
    %96 = vector.load %arg7[%c11, %c0_41] : memref<42x32xf32, #tpu.memory_space<vmem>>, vector<1x32xf32>
    %cst_42 = arith.constant dense<0.000000e+00> : vector<6xf32>
    %97 = vector.multi_reduction <add>, %94, %cst_42 [1] : vector<6x32xf32> to vector<6xf32>
    %98 = vector.shape_cast %97 : vector<6xf32> to vector<6x1xf32>
    %cst_43 = arith.constant 3.200000e+01 : f32
    %99 = vector.broadcast %cst_43 : f32 to vector<6x1xf32>
    %100 = arith.divf %98, %99 : vector<6x1xf32>
    %101 = vector.broadcast %100 : vector<6x1xf32> to vector<6x32xf32>
    %102 = arith.subf %94, %101 : vector<6x32xf32>
    %103 = arith.mulf %102, %102 : vector<6x32xf32>
    %cst_44 = arith.constant dense<0.000000e+00> : vector<6xf32>
    %104 = vector.multi_reduction <add>, %103, %cst_44 [1] : vector<6x32xf32> to vector<6xf32>
    %105 = vector.shape_cast %104 : vector<6xf32> to vector<6x1xf32>
    %cst_45 = arith.constant 3.200000e+01 : f32
    %106 = vector.broadcast %cst_45 : f32 to vector<6x1xf32>
    %107 = arith.divf %105, %106 : vector<6x1xf32>
    %108 = vector.broadcast %100 : vector<6x1xf32> to vector<6x32xf32>
    %109 = arith.subf %94, %108 : vector<6x32xf32>
    %cst_46 = arith.constant 9.99999974E-6 : f32
    %110 = vector.broadcast %cst_46 : f32 to vector<6x1xf32>
    %111 = arith.addf %107, %110 : vector<6x1xf32>
    %112 = math.rsqrt %111 : vector<6x1xf32>
    %113 = vector.broadcast %112 : vector<6x1xf32> to vector<6x32xf32>
    %114 = arith.mulf %109, %113 : vector<6x32xf32>
    %115 = vector.broadcast %95 : vector<1x32xf32> to vector<6x32xf32>
    %116 = arith.mulf %114, %115 : vector<6x32xf32>
    %117 = vector.broadcast %96 : vector<1x32xf32> to vector<6x32xf32>
    %118 = arith.addf %116, %117 : vector<6x32xf32>
    %c320 = arith.constant 320 : index
    %c0_47 = arith.constant 0 : index
    %119 = vector.load %arg6[%c320, %c0_47] : memref<1440x32xf32, #tpu.memory_space<vmem>>, vector<64x32xf32>
    %cst_48 = arith.constant dense<0.000000e+00> : vector<6x32xf32>
    %120 = tpu.matmul %46, %119, %cst_48 {dimension_numbers = #tpu.dot_dimension_numbers<[1], [0], [0], [1], [0, 0, 1, 1], [], []>} : vector<6x64xf32>, vector<64x32xf32>, vector<6x32xf32> -> vector<6x32xf32>
    %c8 = arith.constant 8 : index
    %c0_49 = arith.constant 0 : index
    %121 = vector.load %arg7[%c8, %c0_49] : memref<42x32xf32, #tpu.memory_space<vmem>>, vector<1x32xf32>
    %122 = vector.broadcast %121 : vector<1x32xf32> to vector<6x32xf32>
    %123 = arith.addf %120, %122 : vector<6x32xf32>
    %cst_50 = arith.constant 0.000000e+00 : f32
    %124 = vector.broadcast %cst_50 : f32 to vector<6x32xf32>
    %125 = arith.maximumf %123, %124 : vector<6x32xf32>
    %126 = tpu.concatenate %125, %118, %0 in 1 : vector<6x32xf32>, vector<6x32xf32>, vector<6x32xf32> -> vector<6x96xf32>
    %c384 = arith.constant 384 : index
    %c0_51 = arith.constant 0 : index
    %127 = vector.load %arg6[%c384, %c0_51] : memref<1440x32xf32, #tpu.memory_space<vmem>>, vector<96x32xf32>
    %cst_52 = arith.constant dense<0.000000e+00> : vector<6x32xf32>
    %128 = tpu.matmul %126, %127, %cst_52 {dimension_numbers = #tpu.dot_dimension_numbers<[1], [0], [0], [1], [0, 0, 1, 1], [], []>} : vector<6x96xf32>, vector<96x32xf32>, vector<6x32xf32> -> vector<6x32xf32>
    %c9 = arith.constant 9 : index
    %c0_53 = arith.constant 0 : index
    %129 = vector.load %arg7[%c9, %c0_53] : memref<42x32xf32, #tpu.memory_space<vmem>>, vector<1x32xf32>
    %130 = vector.broadcast %129 : vector<1x32xf32> to vector<6x32xf32>
    %131 = arith.addf %128, %130 : vector<6x32xf32>
    %cst_54 = arith.constant 0.000000e+00 : f32
    %132 = vector.broadcast %cst_54 : f32 to vector<6x32xf32>
    %133 = arith.maximumf %131, %132 : vector<6x32xf32>
    %134 = arith.mulf %125, %133 : vector<6x32xf32>
    %135 = arith.subf %94, %134 : vector<6x32xf32>
    %c12 = arith.constant 12 : index
    %c0_55 = arith.constant 0 : index
    %136 = vector.load %arg7[%c12, %c0_55] : memref<42x32xf32, #tpu.memory_space<vmem>>, vector<1x32xf32>
    %c13 = arith.constant 13 : index
    %c0_56 = arith.constant 0 : index
    %137 = vector.load %arg7[%c13, %c0_56] : memref<42x32xf32, #tpu.memory_space<vmem>>, vector<1x32xf32>
    %cst_57 = arith.constant dense<0.000000e+00> : vector<6xf32>
    %138 = vector.multi_reduction <add>, %135, %cst_57 [1] : vector<6x32xf32> to vector<6xf32>
    %139 = vector.shape_cast %138 : vector<6xf32> to vector<6x1xf32>
    %cst_58 = arith.constant 3.200000e+01 : f32
    %140 = vector.broadcast %cst_58 : f32 to vector<6x1xf32>
    %141 = arith.divf %139, %140 : vector<6x1xf32>
    %142 = vector.broadcast %141 : vector<6x1xf32> to vector<6x32xf32>
    %143 = arith.subf %135, %142 : vector<6x32xf32>
    %144 = arith.mulf %143, %143 : vector<6x32xf32>
    %cst_59 = arith.constant dense<0.000000e+00> : vector<6xf32>
    %145 = vector.multi_reduction <add>, %144, %cst_59 [1] : vector<6x32xf32> to vector<6xf32>
    %146 = vector.shape_cast %145 : vector<6xf32> to vector<6x1xf32>
    %cst_60 = arith.constant 3.200000e+01 : f32
    %147 = vector.broadcast %cst_60 : f32 to vector<6x1xf32>
    %148 = arith.divf %146, %147 : vector<6x1xf32>
    %149 = vector.broadcast %141 : vector<6x1xf32> to vector<6x32xf32>
    %150 = arith.subf %135, %149 : vector<6x32xf32>
    %cst_61 = arith.constant 9.99999974E-6 : f32
    %151 = vector.broadcast %cst_61 : f32 to vector<6x1xf32>
    %152 = arith.addf %148, %151 : vector<6x1xf32>
    %153 = math.rsqrt %152 : vector<6x1xf32>
    %154 = vector.broadcast %153 : vector<6x1xf32> to vector<6x32xf32>
    %155 = arith.mulf %150, %154 : vector<6x32xf32>
    %156 = vector.broadcast %136 : vector<1x32xf32> to vector<6x32xf32>
    %157 = arith.mulf %155, %156 : vector<6x32xf32>
    %158 = vector.broadcast %137 : vector<1x32xf32> to vector<6x32xf32>
    %159 = arith.addf %157, %158 : vector<6x32xf32>
    %160 = tpu.concatenate %45, %0 in 1 : vector<6x32xf32>, vector<6x32xf32> -> vector<6x64xf32>
    %c1248 = arith.constant 1248 : index
    %c0_62 = arith.constant 0 : index
    %161 = vector.load %arg6[%c1248, %c0_62] : memref<1440x32xf32, #tpu.memory_space<vmem>>, vector<64x32xf32>
    %cst_63 = arith.constant dense<0.000000e+00> : vector<6x32xf32>
    %162 = tpu.matmul %160, %161, %cst_63 {dimension_numbers = #tpu.dot_dimension_numbers<[1], [0], [0], [1], [0, 0, 1, 1], [], []>} : vector<6x64xf32>, vector<64x32xf32>, vector<6x32xf32> -> vector<6x32xf32>
    %c36 = arith.constant 36 : index
    %c0_64 = arith.constant 0 : index
    %163 = vector.load %arg7[%c36, %c0_64] : memref<42x32xf32, #tpu.memory_space<vmem>>, vector<1x32xf32>
    %164 = vector.broadcast %163 : vector<1x32xf32> to vector<6x32xf32>
    %165 = arith.addf %162, %164 : vector<6x32xf32>
    %cst_65 = arith.constant 0.000000e+00 : f32
    %166 = vector.broadcast %cst_65 : f32 to vector<6x32xf32>
    %167 = arith.maximumf %165, %166 : vector<6x32xf32>
    %c37 = arith.constant 37 : index
    %c0_66 = arith.constant 0 : index
    %168 = vector.load %arg7[%c37, %c0_66] : memref<42x32xf32, #tpu.memory_space<vmem>>, vector<1x32xf32>
    %169 = vector.broadcast %168 : vector<1x32xf32> to vector<6x32xf32>
    %170 = arith.mulf %167, %169 : vector<6x32xf32>
    %cst_67 = arith.constant dense<0.000000e+00> : vector<6xf32>
    %171 = vector.multi_reduction <add>, %170, %cst_67 [1] : vector<6x32xf32> to vector<6xf32>
    %172 = vector.shape_cast %171 : vector<6xf32> to vector<6x1xf32>
    %173 = arith.negf %172 : vector<6x1xf32>
    %174 = math.exp %173 : vector<6x1xf32>
    %cst_68 = arith.constant 1.000000e+00 : f32
    %175 = vector.broadcast %cst_68 : f32 to vector<6x1xf32>
    %176 = arith.addf %175, %174 : vector<6x1xf32>
    %177 = arith.divf %175, %176 : vector<6x1xf32>
    %cst_69 = arith.constant 1.000000e+00 : f32
    %178 = vector.broadcast %cst_69 : f32 to vector<6x1xf32>
    %179 = arith.subf %178, %177 : vector<6x1xf32>
    %180 = vector.broadcast %179 : vector<6x1xf32> to vector<6x32xf32>
    %181 = arith.mulf %180, %0 : vector<6x32xf32>
    %182 = vector.broadcast %177 : vector<6x1xf32> to vector<6x32xf32>
    %183 = arith.mulf %182, %159 : vector<6x32xf32>
    %184 = arith.addf %181, %183 : vector<6x32xf32>
    %185 = tpu.concatenate %45, %184 in 1 : vector<6x32xf32>, vector<6x32xf32> -> vector<6x64xf32>
    %c480 = arith.constant 480 : index
    %c0_70 = arith.constant 0 : index
    %186 = vector.load %arg6[%c480, %c0_70] : memref<1440x32xf32, #tpu.memory_space<vmem>>, vector<64x32xf32>
    %cst_71 = arith.constant dense<0.000000e+00> : vector<6x32xf32>
    %187 = tpu.matmul %185, %186, %cst_71 {dimension_numbers = #tpu.dot_dimension_numbers<[1], [0], [0], [1], [0, 0, 1, 1], [], []>} : vector<6x64xf32>, vector<64x32xf32>, vector<6x32xf32> -> vector<6x32xf32>
    %c14 = arith.constant 14 : index
    %c0_72 = arith.constant 0 : index
    %188 = vector.load %arg7[%c14, %c0_72] : memref<42x32xf32, #tpu.memory_space<vmem>>, vector<1x32xf32>
    %189 = vector.broadcast %188 : vector<1x32xf32> to vector<6x32xf32>
    %190 = arith.addf %187, %189 : vector<6x32xf32>
    %cst_73 = arith.constant 0.000000e+00 : f32
    %191 = vector.broadcast %cst_73 : f32 to vector<6x32xf32>
    %192 = arith.maximumf %190, %191 : vector<6x32xf32>
    %c17 = arith.constant 17 : index
    %c0_74 = arith.constant 0 : index
    %193 = vector.load %arg7[%c17, %c0_74] : memref<42x32xf32, #tpu.memory_space<vmem>>, vector<1x32xf32>
    %c18 = arith.constant 18 : index
    %c0_75 = arith.constant 0 : index
    %194 = vector.load %arg7[%c18, %c0_75] : memref<42x32xf32, #tpu.memory_space<vmem>>, vector<1x32xf32>
    %cst_76 = arith.constant dense<0.000000e+00> : vector<6xf32>
    %195 = vector.multi_reduction <add>, %192, %cst_76 [1] : vector<6x32xf32> to vector<6xf32>
    %196 = vector.shape_cast %195 : vector<6xf32> to vector<6x1xf32>
    %cst_77 = arith.constant 3.200000e+01 : f32
    %197 = vector.broadcast %cst_77 : f32 to vector<6x1xf32>
    %198 = arith.divf %196, %197 : vector<6x1xf32>
    %199 = vector.broadcast %198 : vector<6x1xf32> to vector<6x32xf32>
    %200 = arith.subf %192, %199 : vector<6x32xf32>
    %201 = arith.mulf %200, %200 : vector<6x32xf32>
    %cst_78 = arith.constant dense<0.000000e+00> : vector<6xf32>
    %202 = vector.multi_reduction <add>, %201, %cst_78 [1] : vector<6x32xf32> to vector<6xf32>
    %203 = vector.shape_cast %202 : vector<6xf32> to vector<6x1xf32>
    %cst_79 = arith.constant 3.200000e+01 : f32
    %204 = vector.broadcast %cst_79 : f32 to vector<6x1xf32>
    %205 = arith.divf %203, %204 : vector<6x1xf32>
    %206 = vector.broadcast %198 : vector<6x1xf32> to vector<6x32xf32>
    %207 = arith.subf %192, %206 : vector<6x32xf32>
    %cst_80 = arith.constant 9.99999974E-6 : f32
    %208 = vector.broadcast %cst_80 : f32 to vector<6x1xf32>
    %209 = arith.addf %205, %208 : vector<6x1xf32>
    %210 = math.rsqrt %209 : vector<6x1xf32>
    %211 = vector.broadcast %210 : vector<6x1xf32> to vector<6x32xf32>
    %212 = arith.mulf %207, %211 : vector<6x32xf32>
    %213 = vector.broadcast %193 : vector<1x32xf32> to vector<6x32xf32>
    %214 = arith.mulf %212, %213 : vector<6x32xf32>
    %215 = vector.broadcast %194 : vector<1x32xf32> to vector<6x32xf32>
    %216 = arith.addf %214, %215 : vector<6x32xf32>
    %c544 = arith.constant 544 : index
    %c0_81 = arith.constant 0 : index
    %217 = vector.load %arg6[%c544, %c0_81] : memref<1440x32xf32, #tpu.memory_space<vmem>>, vector<64x32xf32>
    %cst_82 = arith.constant dense<0.000000e+00> : vector<6x32xf32>
    %218 = tpu.matmul %185, %217, %cst_82 {dimension_numbers = #tpu.dot_dimension_numbers<[1], [0], [0], [1], [0, 0, 1, 1], [], []>} : vector<6x64xf32>, vector<64x32xf32>, vector<6x32xf32> -> vector<6x32xf32>
    %c15 = arith.constant 15 : index
    %c0_83 = arith.constant 0 : index
    %219 = vector.load %arg7[%c15, %c0_83] : memref<42x32xf32, #tpu.memory_space<vmem>>, vector<1x32xf32>
    %220 = vector.broadcast %219 : vector<1x32xf32> to vector<6x32xf32>
    %221 = arith.addf %218, %220 : vector<6x32xf32>
    %cst_84 = arith.constant 0.000000e+00 : f32
    %222 = vector.broadcast %cst_84 : f32 to vector<6x32xf32>
    %223 = arith.maximumf %221, %222 : vector<6x32xf32>
    %224 = tpu.concatenate %223, %216, %45 in 1 : vector<6x32xf32>, vector<6x32xf32>, vector<6x32xf32> -> vector<6x96xf32>
    %c608 = arith.constant 608 : index
    %c0_85 = arith.constant 0 : index
    %225 = vector.load %arg6[%c608, %c0_85] : memref<1440x32xf32, #tpu.memory_space<vmem>>, vector<96x32xf32>
    %cst_86 = arith.constant dense<0.000000e+00> : vector<6x32xf32>
    %226 = tpu.matmul %224, %225, %cst_86 {dimension_numbers = #tpu.dot_dimension_numbers<[1], [0], [0], [1], [0, 0, 1, 1], [], []>} : vector<6x96xf32>, vector<96x32xf32>, vector<6x32xf32> -> vector<6x32xf32>
    %c16 = arith.constant 16 : index
    %c0_87 = arith.constant 0 : index
    %227 = vector.load %arg7[%c16, %c0_87] : memref<42x32xf32, #tpu.memory_space<vmem>>, vector<1x32xf32>
    %228 = vector.broadcast %227 : vector<1x32xf32> to vector<6x32xf32>
    %229 = arith.addf %226, %228 : vector<6x32xf32>
    %cst_88 = arith.constant 0.000000e+00 : f32
    %230 = vector.broadcast %cst_88 : f32 to vector<6x32xf32>
    %231 = arith.maximumf %229, %230 : vector<6x32xf32>
    %232 = arith.mulf %223, %231 : vector<6x32xf32>
    %233 = arith.subf %192, %232 : vector<6x32xf32>
    %c21 = arith.constant 21 : index
    %c0_89 = arith.constant 0 : index
    %234 = vector.load %arg7[%c21, %c0_89] : memref<42x32xf32, #tpu.memory_space<vmem>>, vector<1x32xf32>
    %c22 = arith.constant 22 : index
    %c0_90 = arith.constant 0 : index
    %235 = vector.load %arg7[%c22, %c0_90] : memref<42x32xf32, #tpu.memory_space<vmem>>, vector<1x32xf32>
    %cst_91 = arith.constant dense<0.000000e+00> : vector<6xf32>
    %236 = vector.multi_reduction <add>, %233, %cst_91 [1] : vector<6x32xf32> to vector<6xf32>
    %237 = vector.shape_cast %236 : vector<6xf32> to vector<6x1xf32>
    %cst_92 = arith.constant 3.200000e+01 : f32
    %238 = vector.broadcast %cst_92 : f32 to vector<6x1xf32>
    %239 = arith.divf %237, %238 : vector<6x1xf32>
    %240 = vector.broadcast %239 : vector<6x1xf32> to vector<6x32xf32>
    %241 = arith.subf %233, %240 : vector<6x32xf32>
    %242 = arith.mulf %241, %241 : vector<6x32xf32>
    %cst_93 = arith.constant dense<0.000000e+00> : vector<6xf32>
    %243 = vector.multi_reduction <add>, %242, %cst_93 [1] : vector<6x32xf32> to vector<6xf32>
    %244 = vector.shape_cast %243 : vector<6xf32> to vector<6x1xf32>
    %cst_94 = arith.constant 3.200000e+01 : f32
    %245 = vector.broadcast %cst_94 : f32 to vector<6x1xf32>
    %246 = arith.divf %244, %245 : vector<6x1xf32>
    %247 = vector.broadcast %239 : vector<6x1xf32> to vector<6x32xf32>
    %248 = arith.subf %233, %247 : vector<6x32xf32>
    %cst_95 = arith.constant 9.99999974E-6 : f32
    %249 = vector.broadcast %cst_95 : f32 to vector<6x1xf32>
    %250 = arith.addf %246, %249 : vector<6x1xf32>
    %251 = math.rsqrt %250 : vector<6x1xf32>
    %252 = vector.broadcast %251 : vector<6x1xf32> to vector<6x32xf32>
    %253 = arith.mulf %248, %252 : vector<6x32xf32>
    %254 = vector.broadcast %234 : vector<1x32xf32> to vector<6x32xf32>
    %255 = arith.mulf %253, %254 : vector<6x32xf32>
    %256 = vector.broadcast %235 : vector<1x32xf32> to vector<6x32xf32>
    %257 = arith.addf %255, %256 : vector<6x32xf32>
    %c704 = arith.constant 704 : index
    %c0_96 = arith.constant 0 : index
    %258 = vector.load %arg6[%c704, %c0_96] : memref<1440x32xf32, #tpu.memory_space<vmem>>, vector<64x32xf32>
    %cst_97 = arith.constant dense<0.000000e+00> : vector<6x32xf32>
    %259 = tpu.matmul %185, %258, %cst_97 {dimension_numbers = #tpu.dot_dimension_numbers<[1], [0], [0], [1], [0, 0, 1, 1], [], []>} : vector<6x64xf32>, vector<64x32xf32>, vector<6x32xf32> -> vector<6x32xf32>
    %c19 = arith.constant 19 : index
    %c0_98 = arith.constant 0 : index
    %260 = vector.load %arg7[%c19, %c0_98] : memref<42x32xf32, #tpu.memory_space<vmem>>, vector<1x32xf32>
    %261 = vector.broadcast %260 : vector<1x32xf32> to vector<6x32xf32>
    %262 = arith.addf %259, %261 : vector<6x32xf32>
    %cst_99 = arith.constant 0.000000e+00 : f32
    %263 = vector.broadcast %cst_99 : f32 to vector<6x32xf32>
    %264 = arith.maximumf %262, %263 : vector<6x32xf32>
    %265 = tpu.concatenate %264, %257, %45 in 1 : vector<6x32xf32>, vector<6x32xf32>, vector<6x32xf32> -> vector<6x96xf32>
    %c768 = arith.constant 768 : index
    %c0_100 = arith.constant 0 : index
    %266 = vector.load %arg6[%c768, %c0_100] : memref<1440x32xf32, #tpu.memory_space<vmem>>, vector<96x32xf32>
    %cst_101 = arith.constant dense<0.000000e+00> : vector<6x32xf32>
    %267 = tpu.matmul %265, %266, %cst_101 {dimension_numbers = #tpu.dot_dimension_numbers<[1], [0], [0], [1], [0, 0, 1, 1], [], []>} : vector<6x96xf32>, vector<96x32xf32>, vector<6x32xf32> -> vector<6x32xf32>
    %c20 = arith.constant 20 : index
    %c0_102 = arith.constant 0 : index
    %268 = vector.load %arg7[%c20, %c0_102] : memref<42x32xf32, #tpu.memory_space<vmem>>, vector<1x32xf32>
    %269 = vector.broadcast %268 : vector<1x32xf32> to vector<6x32xf32>
    %270 = arith.addf %267, %269 : vector<6x32xf32>
    %cst_103 = arith.constant 0.000000e+00 : f32
    %271 = vector.broadcast %cst_103 : f32 to vector<6x32xf32>
    %272 = arith.maximumf %270, %271 : vector<6x32xf32>
    %273 = arith.mulf %264, %272 : vector<6x32xf32>
    %274 = arith.subf %233, %273 : vector<6x32xf32>
    %c23 = arith.constant 23 : index
    %c0_104 = arith.constant 0 : index
    %275 = vector.load %arg7[%c23, %c0_104] : memref<42x32xf32, #tpu.memory_space<vmem>>, vector<1x32xf32>
    %c24 = arith.constant 24 : index
    %c0_105 = arith.constant 0 : index
    %276 = vector.load %arg7[%c24, %c0_105] : memref<42x32xf32, #tpu.memory_space<vmem>>, vector<1x32xf32>
    %cst_106 = arith.constant dense<0.000000e+00> : vector<6xf32>
    %277 = vector.multi_reduction <add>, %274, %cst_106 [1] : vector<6x32xf32> to vector<6xf32>
    %278 = vector.shape_cast %277 : vector<6xf32> to vector<6x1xf32>
    %cst_107 = arith.constant 3.200000e+01 : f32
    %279 = vector.broadcast %cst_107 : f32 to vector<6x1xf32>
    %280 = arith.divf %278, %279 : vector<6x1xf32>
    %281 = vector.broadcast %280 : vector<6x1xf32> to vector<6x32xf32>
    %282 = arith.subf %274, %281 : vector<6x32xf32>
    %283 = arith.mulf %282, %282 : vector<6x32xf32>
    %cst_108 = arith.constant dense<0.000000e+00> : vector<6xf32>
    %284 = vector.multi_reduction <add>, %283, %cst_108 [1] : vector<6x32xf32> to vector<6xf32>
    %285 = vector.shape_cast %284 : vector<6xf32> to vector<6x1xf32>
    %cst_109 = arith.constant 3.200000e+01 : f32
    %286 = vector.broadcast %cst_109 : f32 to vector<6x1xf32>
    %287 = arith.divf %285, %286 : vector<6x1xf32>
    %288 = vector.broadcast %280 : vector<6x1xf32> to vector<6x32xf32>
    %289 = arith.subf %274, %288 : vector<6x32xf32>
    %cst_110 = arith.constant 9.99999974E-6 : f32
    %290 = vector.broadcast %cst_110 : f32 to vector<6x1xf32>
    %291 = arith.addf %287, %290 : vector<6x1xf32>
    %292 = math.rsqrt %291 : vector<6x1xf32>
    %293 = vector.broadcast %292 : vector<6x1xf32> to vector<6x32xf32>
    %294 = arith.mulf %289, %293 : vector<6x32xf32>
    %295 = vector.broadcast %275 : vector<1x32xf32> to vector<6x32xf32>
    %296 = arith.mulf %294, %295 : vector<6x32xf32>
    %297 = vector.broadcast %276 : vector<1x32xf32> to vector<6x32xf32>
    %298 = arith.addf %296, %297 : vector<6x32xf32>
    %299 = tpu.concatenate %45, %184 in 1 : vector<6x32xf32>, vector<6x32xf32> -> vector<6x64xf32>
    %c1312 = arith.constant 1312 : index
    %c0_111 = arith.constant 0 : index
    %300 = vector.load %arg6[%c1312, %c0_111] : memref<1440x32xf32, #tpu.memory_space<vmem>>, vector<64x32xf32>
    %cst_112 = arith.constant dense<0.000000e+00> : vector<6x32xf32>
    %301 = tpu.matmul %299, %300, %cst_112 {dimension_numbers = #tpu.dot_dimension_numbers<[1], [0], [0], [1], [0, 0, 1, 1], [], []>} : vector<6x64xf32>, vector<64x32xf32>, vector<6x32xf32> -> vector<6x32xf32>
    %c38 = arith.constant 38 : index
    %c0_113 = arith.constant 0 : index
    %302 = vector.load %arg7[%c38, %c0_113] : memref<42x32xf32, #tpu.memory_space<vmem>>, vector<1x32xf32>
    %303 = vector.broadcast %302 : vector<1x32xf32> to vector<6x32xf32>
    %304 = arith.addf %301, %303 : vector<6x32xf32>
    %305 = math.tanh %304 : vector<6x32xf32>
    %c39 = arith.constant 39 : index
    %c0_114 = arith.constant 0 : index
    %306 = vector.load %arg7[%c39, %c0_114] : memref<42x32xf32, #tpu.memory_space<vmem>>, vector<1x32xf32>
    %307 = vector.broadcast %306 : vector<1x32xf32> to vector<6x32xf32>
    %308 = arith.mulf %305, %307 : vector<6x32xf32>
    %cst_115 = arith.constant dense<0.000000e+00> : vector<6xf32>
    %309 = vector.multi_reduction <add>, %308, %cst_115 [1] : vector<6x32xf32> to vector<6xf32>
    %310 = vector.shape_cast %309 : vector<6xf32> to vector<6x1xf32>
    %cst_116 = arith.constant dense<0xFF800000> : vector<1xf32>
    %311 = vector.multi_reduction <maximumf>, %310, %cst_116 [0] : vector<6x1xf32> to vector<1xf32>
    %312 = vector.shape_cast %311 : vector<1xf32> to vector<1x1xf32>
    %313 = vector.broadcast %312 : vector<1x1xf32> to vector<6x1xf32>
    %314 = arith.subf %310, %313 : vector<6x1xf32>
    %315 = math.exp %314 : vector<6x1xf32>
    %316 = tpu.iota {dimensions = array<i32: 0>} : vector<2x2xi32>
    %317 = tpu.iota {dimensions = array<i32: 1>} : vector<2x2xi32>
    %318 = arith.cmpi eq, %316, %317 : vector<2x2xi32>
    %319 = arith.extui %318 : vector<2x2xi1> to vector<2x2xi32>
    %320 = arith.sitofp %319 : vector<2x2xi32> to vector<2x2xf32>
    %321 = tpu.concatenate %320, %320, %320 in 1 : vector<2x2xf32>, vector<2x2xf32>, vector<2x2xf32> -> vector<2x6xf32>
    %322 = vector.broadcast %315 : vector<6x1xf32> to vector<6x32xf32>
    %323 = arith.mulf %322, %298 : vector<6x32xf32>
    %cst_117 = arith.constant dense<0.000000e+00> : vector<2x32xf32>
    %324 = tpu.matmul %321, %323, %cst_117 {dimension_numbers = #tpu.dot_dimension_numbers<[1], [0], [0], [1], [0, 0, 1, 1], [], []>} : vector<2x6xf32>, vector<6x32xf32>, vector<2x32xf32> -> vector<2x32xf32>
    %cst_118 = arith.constant dense<0.000000e+00> : vector<2x1xf32>
    %325 = tpu.matmul %321, %315, %cst_118 {dimension_numbers = #tpu.dot_dimension_numbers<[1], [0], [0], [1], [0, 0, 1, 1], [], []>} : vector<2x6xf32>, vector<6x1xf32>, vector<2x1xf32> -> vector<2x1xf32>
    %326 = vector.broadcast %325 : vector<2x1xf32> to vector<2x32xf32>
    %327 = arith.divf %324, %326 : vector<2x32xf32>
    %328 = tpu.concatenate %327, %327, %327, %327, %327, %327, %327, %327 in 0 : vector<2x32xf32>, vector<2x32xf32>, vector<2x32xf32>, vector<2x32xf32>, vector<2x32xf32>, vector<2x32xf32>, vector<2x32xf32>, vector<2x32xf32> -> vector<16x32xf32>
    %329 = tpu.concatenate %328, %1 in 1 : vector<16x32xf32>, vector<16x32xf32> -> vector<16x64xf32>
    %c1376 = arith.constant 1376 : index
    %c0_119 = arith.constant 0 : index
    %330 = vector.load %arg6[%c1376, %c0_119] : memref<1440x32xf32, #tpu.memory_space<vmem>>, vector<64x32xf32>
    %cst_120 = arith.constant dense<0.000000e+00> : vector<16x32xf32>
    %331 = tpu.matmul %329, %330, %cst_120 {dimension_numbers = #tpu.dot_dimension_numbers<[1], [0], [0], [1], [0, 0, 1, 1], [], []>} : vector<16x64xf32>, vector<64x32xf32>, vector<16x32xf32> -> vector<16x32xf32>
    %c40 = arith.constant 40 : index
    %c0_121 = arith.constant 0 : index
    %332 = vector.load %arg7[%c40, %c0_121] : memref<42x32xf32, #tpu.memory_space<vmem>>, vector<1x32xf32>
    %333 = vector.broadcast %332 : vector<1x32xf32> to vector<16x32xf32>
    %334 = arith.addf %331, %333 : vector<16x32xf32>
    %335 = math.tanh %334 : vector<16x32xf32>
    %c41 = arith.constant 41 : index
    %c0_122 = arith.constant 0 : index
    %336 = vector.load %arg7[%c41, %c0_122] : memref<42x32xf32, #tpu.memory_space<vmem>>, vector<1x32xf32>
    %337 = vector.broadcast %336 : vector<1x32xf32> to vector<16x32xf32>
    %338 = arith.mulf %335, %337 : vector<16x32xf32>
    %cst_123 = arith.constant dense<0.000000e+00> : vector<16xf32>
    %339 = vector.multi_reduction <add>, %338, %cst_123 [1] : vector<16x32xf32> to vector<16xf32>
    %340 = vector.shape_cast %339 : vector<16xf32> to vector<16x1xf32>
    %c0_124 = arith.constant 0 : index
    %c0_125 = arith.constant 0 : index
    %341 = vector.load %arg5[%c0_124, %c0_125] : memref<16x1xf32, #tpu.memory_space<vmem>>, vector<16x1xf32>
    %cst_126 = arith.constant 5.000000e-01 : f32
    %342 = vector.broadcast %cst_126 : f32 to vector<16x1xf32>
    %343 = arith.cmpf ogt, %341, %342 : vector<16x1xf32>
    %cst_127 = arith.constant -9.99999995E+11 : f32
    %344 = vector.broadcast %cst_127 : f32 to vector<16x1xf32>
    %345 = arith.select %343, %344, %340 : vector<16x1xi1>, vector<16x1xf32>
    %cst_128 = arith.constant dense<0xFF800000> : vector<1xf32>
    %346 = vector.multi_reduction <maximumf>, %345, %cst_128 [0] : vector<16x1xf32> to vector<1xf32>
    %347 = vector.shape_cast %346 : vector<1xf32> to vector<1x1xf32>
    %348 = vector.broadcast %347 : vector<1x1xf32> to vector<16x1xf32>
    %349 = arith.subf %345, %348 : vector<16x1xf32>
    %350 = math.exp %349 : vector<16x1xf32>
    %351 = tpu.iota {dimensions = array<i32: 0>} : vector<2x2xi32>
    %352 = tpu.iota {dimensions = array<i32: 1>} : vector<2x2xi32>
    %353 = arith.cmpi eq, %351, %352 : vector<2x2xi32>
    %354 = arith.extui %353 : vector<2x2xi1> to vector<2x2xi32>
    %355 = arith.sitofp %354 : vector<2x2xi32> to vector<2x2xf32>
    %356 = tpu.concatenate %355, %355, %355, %355, %355, %355, %355, %355 in 1 : vector<2x2xf32>, vector<2x2xf32>, vector<2x2xf32>, vector<2x2xf32>, vector<2x2xf32>, vector<2x2xf32>, vector<2x2xf32>, vector<2x2xf32> -> vector<2x16xf32>
    %357 = vector.broadcast %350 : vector<16x1xf32> to vector<16x32xf32>
    %358 = arith.mulf %357, %1 : vector<16x32xf32>
    %cst_129 = arith.constant dense<0.000000e+00> : vector<2x32xf32>
    %359 = tpu.matmul %356, %358, %cst_129 {dimension_numbers = #tpu.dot_dimension_numbers<[1], [0], [0], [1], [0, 0, 1, 1], [], []>} : vector<2x16xf32>, vector<16x32xf32>, vector<2x32xf32> -> vector<2x32xf32>
    %cst_130 = arith.constant dense<0.000000e+00> : vector<2x1xf32>
    %360 = tpu.matmul %356, %350, %cst_130 {dimension_numbers = #tpu.dot_dimension_numbers<[1], [0], [0], [1], [0, 0, 1, 1], [], []>} : vector<2x16xf32>, vector<16x1xf32>, vector<2x1xf32> -> vector<2x1xf32>
    %361 = vector.broadcast %360 : vector<2x1xf32> to vector<2x32xf32>
    %362 = arith.divf %359, %361 : vector<2x32xf32>
    %363 = tpu.concatenate %327, %362 in 1 : vector<2x32xf32>, vector<2x32xf32> -> vector<2x64xf32>
    %c864 = arith.constant 864 : index
    %c0_131 = arith.constant 0 : index
    %364 = vector.load %arg6[%c864, %c0_131] : memref<1440x32xf32, #tpu.memory_space<vmem>>, vector<64x32xf32>
    %cst_132 = arith.constant dense<0.000000e+00> : vector<2x32xf32>
    %365 = tpu.matmul %363, %364, %cst_132 {dimension_numbers = #tpu.dot_dimension_numbers<[1], [0], [0], [1], [0, 0, 1, 1], [], []>} : vector<2x64xf32>, vector<64x32xf32>, vector<2x32xf32> -> vector<2x32xf32>
    %c25 = arith.constant 25 : index
    %c0_133 = arith.constant 0 : index
    %366 = vector.load %arg7[%c25, %c0_133] : memref<42x32xf32, #tpu.memory_space<vmem>>, vector<1x32xf32>
    %367 = vector.broadcast %366 : vector<1x32xf32> to vector<2x32xf32>
    %368 = arith.addf %365, %367 : vector<2x32xf32>
    %cst_134 = arith.constant 0.000000e+00 : f32
    %369 = vector.broadcast %cst_134 : f32 to vector<2x32xf32>
    %370 = arith.maximumf %368, %369 : vector<2x32xf32>
    %c28 = arith.constant 28 : index
    %c0_135 = arith.constant 0 : index
    %371 = vector.load %arg7[%c28, %c0_135] : memref<42x32xf32, #tpu.memory_space<vmem>>, vector<1x32xf32>
    %c29 = arith.constant 29 : index
    %c0_136 = arith.constant 0 : index
    %372 = vector.load %arg7[%c29, %c0_136] : memref<42x32xf32, #tpu.memory_space<vmem>>, vector<1x32xf32>
    %cst_137 = arith.constant dense<0.000000e+00> : vector<2xf32>
    %373 = vector.multi_reduction <add>, %370, %cst_137 [1] : vector<2x32xf32> to vector<2xf32>
    %374 = vector.shape_cast %373 : vector<2xf32> to vector<2x1xf32>
    %cst_138 = arith.constant 3.200000e+01 : f32
    %375 = vector.broadcast %cst_138 : f32 to vector<2x1xf32>
    %376 = arith.divf %374, %375 : vector<2x1xf32>
    %377 = vector.broadcast %376 : vector<2x1xf32> to vector<2x32xf32>
    %378 = arith.subf %370, %377 : vector<2x32xf32>
    %379 = arith.mulf %378, %378 : vector<2x32xf32>
    %cst_139 = arith.constant dense<0.000000e+00> : vector<2xf32>
    %380 = vector.multi_reduction <add>, %379, %cst_139 [1] : vector<2x32xf32> to vector<2xf32>
    %381 = vector.shape_cast %380 : vector<2xf32> to vector<2x1xf32>
    %cst_140 = arith.constant 3.200000e+01 : f32
    %382 = vector.broadcast %cst_140 : f32 to vector<2x1xf32>
    %383 = arith.divf %381, %382 : vector<2x1xf32>
    %384 = vector.broadcast %376 : vector<2x1xf32> to vector<2x32xf32>
    %385 = arith.subf %370, %384 : vector<2x32xf32>
    %cst_141 = arith.constant 9.99999974E-6 : f32
    %386 = vector.broadcast %cst_141 : f32 to vector<2x1xf32>
    %387 = arith.addf %383, %386 : vector<2x1xf32>
    %388 = math.rsqrt %387 : vector<2x1xf32>
    %389 = vector.broadcast %388 : vector<2x1xf32> to vector<2x32xf32>
    %390 = arith.mulf %385, %389 : vector<2x32xf32>
    %391 = vector.broadcast %371 : vector<1x32xf32> to vector<2x32xf32>
    %392 = arith.mulf %390, %391 : vector<2x32xf32>
    %393 = vector.broadcast %372 : vector<1x32xf32> to vector<2x32xf32>
    %394 = arith.addf %392, %393 : vector<2x32xf32>
    %c928 = arith.constant 928 : index
    %c0_142 = arith.constant 0 : index
    %395 = vector.load %arg6[%c928, %c0_142] : memref<1440x32xf32, #tpu.memory_space<vmem>>, vector<64x32xf32>
    %cst_143 = arith.constant dense<0.000000e+00> : vector<2x32xf32>
    %396 = tpu.matmul %363, %395, %cst_143 {dimension_numbers = #tpu.dot_dimension_numbers<[1], [0], [0], [1], [0, 0, 1, 1], [], []>} : vector<2x64xf32>, vector<64x32xf32>, vector<2x32xf32> -> vector<2x32xf32>
    %c26 = arith.constant 26 : index
    %c0_144 = arith.constant 0 : index
    %397 = vector.load %arg7[%c26, %c0_144] : memref<42x32xf32, #tpu.memory_space<vmem>>, vector<1x32xf32>
    %398 = vector.broadcast %397 : vector<1x32xf32> to vector<2x32xf32>
    %399 = arith.addf %396, %398 : vector<2x32xf32>
    %cst_145 = arith.constant 0.000000e+00 : f32
    %400 = vector.broadcast %cst_145 : f32 to vector<2x32xf32>
    %401 = arith.maximumf %399, %400 : vector<2x32xf32>
    %402 = tpu.concatenate %401, %394, %327 in 1 : vector<2x32xf32>, vector<2x32xf32>, vector<2x32xf32> -> vector<2x96xf32>
    %c992 = arith.constant 992 : index
    %c0_146 = arith.constant 0 : index
    %403 = vector.load %arg6[%c992, %c0_146] : memref<1440x32xf32, #tpu.memory_space<vmem>>, vector<96x32xf32>
    %cst_147 = arith.constant dense<0.000000e+00> : vector<2x32xf32>
    %404 = tpu.matmul %402, %403, %cst_147 {dimension_numbers = #tpu.dot_dimension_numbers<[1], [0], [0], [1], [0, 0, 1, 1], [], []>} : vector<2x96xf32>, vector<96x32xf32>, vector<2x32xf32> -> vector<2x32xf32>
    %c27 = arith.constant 27 : index
    %c0_148 = arith.constant 0 : index
    %405 = vector.load %arg7[%c27, %c0_148] : memref<42x32xf32, #tpu.memory_space<vmem>>, vector<1x32xf32>
    %406 = vector.broadcast %405 : vector<1x32xf32> to vector<2x32xf32>
    %407 = arith.addf %404, %406 : vector<2x32xf32>
    %cst_149 = arith.constant 0.000000e+00 : f32
    %408 = vector.broadcast %cst_149 : f32 to vector<2x32xf32>
    %409 = arith.maximumf %407, %408 : vector<2x32xf32>
    %410 = arith.mulf %401, %409 : vector<2x32xf32>
    %411 = arith.subf %370, %410 : vector<2x32xf32>
    %c32 = arith.constant 32 : index
    %c0_150 = arith.constant 0 : index
    %412 = vector.load %arg7[%c32, %c0_150] : memref<42x32xf32, #tpu.memory_space<vmem>>, vector<1x32xf32>
    %c33 = arith.constant 33 : index
    %c0_151 = arith.constant 0 : index
    %413 = vector.load %arg7[%c33, %c0_151] : memref<42x32xf32, #tpu.memory_space<vmem>>, vector<1x32xf32>
    %cst_152 = arith.constant dense<0.000000e+00> : vector<2xf32>
    %414 = vector.multi_reduction <add>, %411, %cst_152 [1] : vector<2x32xf32> to vector<2xf32>
    %415 = vector.shape_cast %414 : vector<2xf32> to vector<2x1xf32>
    %cst_153 = arith.constant 3.200000e+01 : f32
    %416 = vector.broadcast %cst_153 : f32 to vector<2x1xf32>
    %417 = arith.divf %415, %416 : vector<2x1xf32>
    %418 = vector.broadcast %417 : vector<2x1xf32> to vector<2x32xf32>
    %419 = arith.subf %411, %418 : vector<2x32xf32>
    %420 = arith.mulf %419, %419 : vector<2x32xf32>
    %cst_154 = arith.constant dense<0.000000e+00> : vector<2xf32>
    %421 = vector.multi_reduction <add>, %420, %cst_154 [1] : vector<2x32xf32> to vector<2xf32>
    %422 = vector.shape_cast %421 : vector<2xf32> to vector<2x1xf32>
    %cst_155 = arith.constant 3.200000e+01 : f32
    %423 = vector.broadcast %cst_155 : f32 to vector<2x1xf32>
    %424 = arith.divf %422, %423 : vector<2x1xf32>
    %425 = vector.broadcast %417 : vector<2x1xf32> to vector<2x32xf32>
    %426 = arith.subf %411, %425 : vector<2x32xf32>
    %cst_156 = arith.constant 9.99999974E-6 : f32
    %427 = vector.broadcast %cst_156 : f32 to vector<2x1xf32>
    %428 = arith.addf %424, %427 : vector<2x1xf32>
    %429 = math.rsqrt %428 : vector<2x1xf32>
    %430 = vector.broadcast %429 : vector<2x1xf32> to vector<2x32xf32>
    %431 = arith.mulf %426, %430 : vector<2x32xf32>
    %432 = vector.broadcast %412 : vector<1x32xf32> to vector<2x32xf32>
    %433 = arith.mulf %431, %432 : vector<2x32xf32>
    %434 = vector.broadcast %413 : vector<1x32xf32> to vector<2x32xf32>
    %435 = arith.addf %433, %434 : vector<2x32xf32>
    %c1088 = arith.constant 1088 : index
    %c0_157 = arith.constant 0 : index
    %436 = vector.load %arg6[%c1088, %c0_157] : memref<1440x32xf32, #tpu.memory_space<vmem>>, vector<64x32xf32>
    %cst_158 = arith.constant dense<0.000000e+00> : vector<2x32xf32>
    %437 = tpu.matmul %363, %436, %cst_158 {dimension_numbers = #tpu.dot_dimension_numbers<[1], [0], [0], [1], [0, 0, 1, 1], [], []>} : vector<2x64xf32>, vector<64x32xf32>, vector<2x32xf32> -> vector<2x32xf32>
    %c30 = arith.constant 30 : index
    %c0_159 = arith.constant 0 : index
    %438 = vector.load %arg7[%c30, %c0_159] : memref<42x32xf32, #tpu.memory_space<vmem>>, vector<1x32xf32>
    %439 = vector.broadcast %438 : vector<1x32xf32> to vector<2x32xf32>
    %440 = arith.addf %437, %439 : vector<2x32xf32>
    %cst_160 = arith.constant 0.000000e+00 : f32
    %441 = vector.broadcast %cst_160 : f32 to vector<2x32xf32>
    %442 = arith.maximumf %440, %441 : vector<2x32xf32>
    %443 = tpu.concatenate %442, %435, %327 in 1 : vector<2x32xf32>, vector<2x32xf32>, vector<2x32xf32> -> vector<2x96xf32>
    %c1152 = arith.constant 1152 : index
    %c0_161 = arith.constant 0 : index
    %444 = vector.load %arg6[%c1152, %c0_161] : memref<1440x32xf32, #tpu.memory_space<vmem>>, vector<96x32xf32>
    %cst_162 = arith.constant dense<0.000000e+00> : vector<2x32xf32>
    %445 = tpu.matmul %443, %444, %cst_162 {dimension_numbers = #tpu.dot_dimension_numbers<[1], [0], [0], [1], [0, 0, 1, 1], [], []>} : vector<2x96xf32>, vector<96x32xf32>, vector<2x32xf32> -> vector<2x32xf32>
    %c31 = arith.constant 31 : index
    %c0_163 = arith.constant 0 : index
    %446 = vector.load %arg7[%c31, %c0_163] : memref<42x32xf32, #tpu.memory_space<vmem>>, vector<1x32xf32>
    %447 = vector.broadcast %446 : vector<1x32xf32> to vector<2x32xf32>
    %448 = arith.addf %445, %447 : vector<2x32xf32>
    %cst_164 = arith.constant 0.000000e+00 : f32
    %449 = vector.broadcast %cst_164 : f32 to vector<2x32xf32>
    %450 = arith.maximumf %448, %449 : vector<2x32xf32>
    %451 = arith.mulf %442, %450 : vector<2x32xf32>
    %452 = arith.subf %411, %451 : vector<2x32xf32>
    %c34 = arith.constant 34 : index
    %c0_165 = arith.constant 0 : index
    %453 = vector.load %arg7[%c34, %c0_165] : memref<42x32xf32, #tpu.memory_space<vmem>>, vector<1x32xf32>
    %c35 = arith.constant 35 : index
    %c0_166 = arith.constant 0 : index
    %454 = vector.load %arg7[%c35, %c0_166] : memref<42x32xf32, #tpu.memory_space<vmem>>, vector<1x32xf32>
    %cst_167 = arith.constant dense<0.000000e+00> : vector<2xf32>
    %455 = vector.multi_reduction <add>, %452, %cst_167 [1] : vector<2x32xf32> to vector<2xf32>
    %456 = vector.shape_cast %455 : vector<2xf32> to vector<2x1xf32>
    %cst_168 = arith.constant 3.200000e+01 : f32
    %457 = vector.broadcast %cst_168 : f32 to vector<2x1xf32>
    %458 = arith.divf %456, %457 : vector<2x1xf32>
    %459 = vector.broadcast %458 : vector<2x1xf32> to vector<2x32xf32>
    %460 = arith.subf %452, %459 : vector<2x32xf32>
    %461 = arith.mulf %460, %460 : vector<2x32xf32>
    %cst_169 = arith.constant dense<0.000000e+00> : vector<2xf32>
    %462 = vector.multi_reduction <add>, %461, %cst_169 [1] : vector<2x32xf32> to vector<2xf32>
    %463 = vector.shape_cast %462 : vector<2xf32> to vector<2x1xf32>
    %cst_170 = arith.constant 3.200000e+01 : f32
    %464 = vector.broadcast %cst_170 : f32 to vector<2x1xf32>
    %465 = arith.divf %463, %464 : vector<2x1xf32>
    %466 = vector.broadcast %458 : vector<2x1xf32> to vector<2x32xf32>
    %467 = arith.subf %452, %466 : vector<2x32xf32>
    %cst_171 = arith.constant 9.99999974E-6 : f32
    %468 = vector.broadcast %cst_171 : f32 to vector<2x1xf32>
    %469 = arith.addf %465, %468 : vector<2x1xf32>
    %470 = math.rsqrt %469 : vector<2x1xf32>
    %471 = vector.broadcast %470 : vector<2x1xf32> to vector<2x32xf32>
    %472 = arith.mulf %467, %471 : vector<2x32xf32>
    %473 = vector.broadcast %453 : vector<1x32xf32> to vector<2x32xf32>
    %474 = arith.mulf %472, %473 : vector<2x32xf32>
    %475 = vector.broadcast %454 : vector<1x32xf32> to vector<2x32xf32>
    %476 = arith.addf %474, %475 : vector<2x32xf32>
    %c0_172 = arith.constant 0 : index
    %c0_173 = arith.constant 0 : index
    %477 = vector.load %arg8[%c0_172, %c0_173] : memref<2x32xf32, #tpu.memory_space<vmem>>, vector<2x32xf32>
    tpu.vector_store %arg8[%c0_172, %c0_173], %476 {strides = array<i32>} : memref<2x32xf32, #tpu.memory_space<vmem>>, vector<2x32xf32>,
    %478 = tpu.concatenate %184, %327 in 0 : vector<6x32xf32>, vector<2x32xf32> -> vector<8x32xf32>
    %c0_174 = arith.constant 0 : index
    %c0_175 = arith.constant 0 : index
    %479 = vector.load %arg9[%c0_174, %c0_175] : memref<8x32xf32, #tpu.memory_space<vmem>>, vector<8x32xf32>
    tpu.vector_store %arg9[%c0_174, %c0_175], %478 {strides = array<i32>} : memref<8x32xf32, #tpu.memory_space<vmem>>, vector<8x32xf32>,
    return
  }
}

</mosaic_0001>

<bundles_post_ra>
// kernel: decoder_pallas.1
= control target key start
LH: loop header
LB: loop body
LE: loop exit
PB: predicated region body
PF: predicated region fallthrough
CT: control target
= control target key end

     0   :  { %15 = vsyncpa [#allocation4], 0  ;;  %s2634_s0 = inlined_call_operand.vmem [shape: s32[2], index: 0, kind: input, shape index: {}]   ;;  %s2635_s1 = inlined_call_operand.vmem [shape: f32[32,32], index: 1, kind: input, shape index: {}]   ;;  %s2636_s2 = inlined_call_operand.vmem [shape: f32[2,32], index: 2, kind: input, shape index: {}]   ;;  %s2637_s3 = inlined_call_operand.vmem [shape: f32[6,32], index: 3, kind: input, shape index: {}]   ;;  %s2638_s4 = inlined_call_operand.vmem [shape: f32[16,32], index: 4, kind: input, shape index: {}]   ;;  %s2639_s5 = inlined_call_operand.vmem [shape: f32[16,1], index: 5, kind: input, shape index: {}]   ;;  %s2640_s6 = inlined_call_operand.vmem [shape: f32[1440,32], index: 6, kind: input, shape index: {}]   ;;  %s2641_s7 = inlined_call_operand.vmem [shape: f32[42,32], index: 7, kind: input, shape index: {}]   ;;  %s2642_s8 = inlined_call_operand.hbm [shape: f32[2,32], index: 8, kind: output, shape index: {0}]   ;;  %s2643_s9 = inlined_call_operand.hbm [shape: f32[8,32], index: 9, kind: output, shape index: {1}]  }
   0x1   :  { %16 = vsyncpa [#allocation3], 0 }
   0x2   :  { %17 = vsyncpa [#allocation7], 0  ;;  %s23_s11 = sshll.u32 %s2634_s0, 4  ;;  %s1634_s12 = smov [#allocation2]   ;;  %s24_s11 = int_to_ptr.vmem [resolvable:$true] %s23_s11 }
   0x3   :  { %26 = dma.vmem_to_smem %s24_s11, 16, %s1634_s12, [#allocation4]  }
   0x4   :  { %1628 = dma.done.wait [#allocation4], 16  }
   0x5   :  { %1629 = vsyncadd [#allocation4], 4294967280 }
   0x6   :  { %45 = sfence }
   0x7   :  { %v49_v0 = vld [vmem:[%s2636_s2] sm:$0x3]  ;;  %s50_s15 = sld [smem:[#allocation2]]  ;;  %s1635_s16 = smov 32   ;;  %v85_v1 = vld [vmem:[%s2640_s6 + $0x58] sm:$0xff]  ;;  %v84_v2 = vld [vmem:[%s2640_s6 + $0x50] sm:$0xff] }
   0x8   :  { %63 = vrot.lane.b32.xlu0 %v49_v0, %s1635_s16  ;;  %s1436_s17 = sld [smem:[#allocation2 + $0x1]]  ;;  %vm60_vm0 = vcmask 1040384   ;;  %96 = vmatpush.msra.mxu0 %v85_v1  ;;  %v83_v3 = vld [vmem:[%s2640_s6 + $0x48] sm:$0xff]  ;;  %v82_v4 = vld [vmem:[%s2640_s6 + $0x40] sm:$0xff]  ;;  %v81_v5 = vld [vmem:[%s2640_s6 + $0x38] sm:$0xff]  ;;  %vm70_vm1 = vcmask 261120  }
   0x9   :  { %v80_v7 = vld [vmem:[%s2640_s6 + $0x30] sm:$0xff]  ;;  %v79_v10 = vld [vmem:[%s2640_s6 + $0x28] sm:$0xff]  ;;  %v78_v12 = vld [vmem:[%s2640_s6 + $0x20] sm:$0xff]  ;;  %vm72_vm2 = vcmask 523264   ;;  %vm88_vm3 = vcmask 785408   ;;  %vm115_vm4 = vcmask 254976  }
   0xa   :  { %97 = vmatpush.msra.mxu0 %v84_v2  ;;  %v77_v13 = vld [vmem:[%s2640_s6 + $0x18] sm:$0xff]  ;;  %v76_v14 = vld [vmem:[%s2640_s6 + $0x10] sm:$0xff]  ;;  %v75_v15 = vld [vmem:[%s2640_s6 + $0x8] sm:$0xff]  ;;  %v1637_v27 = vmov 32.0   ;;  %vm154_vm9 = vcmask 1041408   ;;  %vm156_vm10 = vcmask 1043456  }
   0xb   :  { %v74_v16 = vld [vmem:[%s2640_s6] sm:$0xff]  ;;  %1526 = vrcp.f32 %v1637_v27  ;;  %v170_v41 = vld [vmem:[%s2640_s6 + $0x98] sm:$0xff]  ;;  %v169_v42 = vld [vmem:[%s2640_s6 + $0x90] sm:$0xff]  ;;  %vm199_vm11 = vcmask 259072   ;;  %s1639_s26 = smov 2   ;;  %s1641_s29 = smov 6  }
   0xc   :  { %98 = vmatpush.msra.mxu0 %v83_v3  ;;  %v1753_v18 = vld [vmem:[%s2637_s3] sm:$0x3f]  ;;  %184 = vmatpush.msra.mxu1 %v170_v41  ;;  %v233_v43 = vld [vmem:[%s2640_s6 + $0xd8] sm:$0xff]  ;;  %v168_v45 = vld [vmem:[%s2640_s6 + $0x88] sm:$0xff]  ;;  %s1642_s30 = smov 8   ;;  %s1648_s14 = smov [#allocation5]  }
   0xd   :  { %s51_s28 = scalar_lea.vmem %s2635_s1, %s50_s15  ;;  %s1636_s15 = smov 64   ;;  %v1484_v22 = vld [vmem:[%s2641_s7] ss:$0 sm:$0xff]  ;;  %244 = vmatpush.msra.mxu2 %v233_v43  ;;  %v232_v46 = vld [vmem:[%s2640_s6 + $0xd0] sm:$0xff]  ;;  %v231_v47 = vld [vmem:[%s2640_s6 + $0xc8] sm:$0xff] }
   0xe   :  { %v52_v6 = vld [vmem:[%s51_s28] sm:$0x1]  ;;  %s1434_s10 = scalar_lea.vmem %s2635_s1, %s1436_s17  ;;  %99 = vmatpush.msra.mxu0 %v82_v4  ;;  %185 = vmatpush.msra.mxu1 %v169_v42  ;;  %v166_v50 = vld [vmem:[%s2640_s6 + $0x78] sm:$0xff]  ;;  %v165_v52 = vld [vmem:[%s2640_s6 + $0x70] sm:$0xff]  ;;  %s1640_s28 = smov 4  }
   0xf   :  { %v1437_v8 = vld [vmem:[%s1434_s10 + $0x10] sm:$0x1]  ;;  %v167_v48 = vld [vmem:[%s2640_s6 + $0x80] sm:$0xff]  ;;  %245 = vmatpush.msra.mxu2 %v232_v46  ;;  %v229_v51 = vld [vmem:[%s2640_s6 + $0xb8] sm:$0xff]  ;;  %s1644_s10 = smov 14   ;;  %s1645_s1 = smov 10  }
  0x10   :  { %v58_v9 = vrot.slane %v1437_v8, 7  ;;  %100 = vmatpush.msra.mxu0 %v81_v5  ;;  %186 = vmatpush.msra.mxu1 %v168_v45  ;;  %v230_v49 = vld [vmem:[%s2640_s6 + $0xc0] sm:$0xff]  ;;  %v228_v53 = vld [vmem:[%s2640_s6 + $0xb0] sm:$0xff]  ;;  %v164_v55 = vld [vmem:[%s2640_s6 + $0x68] sm:$0xff]  ;;  %s1646_s17 = smov 12   ;;  %s1407_s18 = sshll.u32 %s2642_s8, 4  ;;  %s1408_s18 = int_to_ptr.hbm [resolvable:$true] %s1407_s18 }
  0x11   :  { %v1527_v28 = vpop.eup %1526  ;;  %246 = vmatpush.msra.mxu2 %v231_v47  ;;  %v227_v57 = vld [vmem:[%s2640_s6 + $0xa8] sm:$0xff]  ;;  %v163_v58 = vld [vmem:[%s2640_s6 + $0x60] sm:$0xff]  ;;  %v342_v60 = vld [vmem:[%s2640_s6 + $0x178] sm:$0xff] }
  0x12   :  { %v61_v11 = vsel %vm60_vm0, %v52_v6, %v58_v9  ;;  %101 = vmatpush.msra.mxu0 %v80_v7  ;;  %v120_v29 = vmul.f32 32.0, %v1527_v28  ;;  %vm124_vm5 = vweird.f32 %v1527_v28  ;;  %187 = vmatpush.msra.mxu1 %v167_v48  ;;  %v341_v62 = vld [vmem:[%s2640_s6 + $0x170] sm:$0xff]  ;;  %v340_v0 = vld [vmem:[%s2640_s6 + $0x168] sm:$0xff]  ;;  %v1485_v2 = vld [vmem:[%s2641_s7 + $0x1] ss:$0 sm:$0xff] }
  0x13   :  { %67 = vrot.lane.b32.xlu0 %v61_v11, %s1636_s15  ;;  %247 = vmatpush.msra.mxu2 %v230_v49  ;;  %v1486_v5 = vld [vmem:[%s2641_s7 + $0x2] ss:$0 sm:$0xff]  ;;  %v273_v42 = vld [vmem:[%s2640_s6 + $0x110] sm:$0xff]  ;;  %v1490_v48 = vld [vmem:[%s2641_s7 + $0x6] ss:$0 sm:$0xff] }
  0x14   :  { %102 = vmatpush.msra.mxu0 %v79_v10  ;;  %v121_v30 = vsub.f32 1.0, %v120_v29  ;;  %188 = vmatpush.msra.mxu1 %v166_v50 }
  0x15   :  { %248 = vmatpush.msra.mxu2 %v229_v51  ;;  %v1491_v51 = vld [vmem:[%s2641_s7 + $0x7] ss:$0 sm:$0xff] }
  0x16   :  { %103 = vmatpush.msra.mxu0 %v78_v12  ;;  %v122_v31 = vmul.f32 %v1527_v28, %v121_v30  ;;  %189 = vmatpush.msra.mxu1 %v165_v52  ;;  %v226_v12 = vld [vmem:[%s2640_s6 + $0xa0] sm:$0xff] }
  0x17   :  { %249 = vmatpush.msra.mxu2 %v228_v53 }
  0x18   :  { %104 = vmatpush.msra.mxu0 %v77_v13  ;;  %v123_v32 = vadd.f32 %v1527_v28, %v122_v31  ;;  %190 = vmatpush.msra.mxu1 %v164_v55  ;;  %v339_v13 = vld [vmem:[%s2640_s6 + $0x160] sm:$0xff]  ;;  %v270_v55 = vld [vmem:[%s2640_s6 + $0xf8] sm:$0xff] }
  0x19   :  { %250 = vmatpush.msra.mxu2 %v227_v57  ;;  %v268_v57 = vld [vmem:[%s2640_s6 + $0xe8] sm:$0xff] }
  0x1a   :  { %105 = vmatpush.msra.mxu0 %v76_v14  ;;  %v1763_v33 = vsel %vm124_vm5, %v1527_v28, %v123_v32  ;;  %191 = vmatpush.msra.mxu1 %v163_v58  ;;  %v338_v14 = vld [vmem:[%s2640_s6 + $0x158] sm:$0xff]  ;;  %v267_v58 = vld [vmem:[%s2640_s6 + $0xe0] sm:$0xff] }
  0x1b   :  { %251 = vmatpush.msra.mxu2 %v226_v12 }
  0x1c   :  { %106 = vmatpush.msra.mxu0 %v75_v15  ;;  %353 = vmatpush.msrb.mxu1 %v342_v60  ;;  %v337_v15 = vld [vmem:[%s2640_s6 + $0x150] sm:$0xff] }
  0x1e   :  { %107 = vmatpush.msra.mxu0 %v74_v16  ;;  %354 = vmatpush.msrb.mxu1 %v341_v62  ;;  %v336_v16 = vld [vmem:[%s2640_s6 + $0x148] sm:$0xff] }
  0x20   :  { %355 = vmatpush.msrb.mxu1 %v340_v0 }
  0x22   :  { %356 = vmatpush.msrb.mxu1 %v339_v13 }
  0x24   :  { %357 = vmatpush.msrb.mxu1 %v338_v14 }
  0x26   :  { %358 = vmatpush.msrb.mxu1 %v337_v15 }
  0x28   :  { %359 = vmatpush.msrb.mxu1 %v336_v16  ;;  %v383_v16 = vld [vmem:[%s2640_s6 + $0x1d8] sm:$0xff] }
  0x29   :  { %393 = vmatpush.msrb.mxu2 %v383_v16 }
  0x7a   :  { %v64_v17 = vpop.permute.xlu0 %63 }
  0x7b   :  { %v71_v19 = vsel %vm70_vm1, %v1753_v18, %v64_v17  ;;  %v335_v17 = vld [vmem:[%s2640_s6 + $0x140] sm:$0xff] }
  0x7c   :  { %360 = vmatpush.msrb.mxu1 %v335_v17  ;;  %v382_v17 = vld [vmem:[%s2640_s6 + $0x1d0] sm:$0xff] }
  0x7d   :  { %394 = vmatpush.msrb.mxu2 %v382_v17 }
  0x85   :  { %v68_v20 = vpop.permute.xlu0 %67 }
  0x86   :  { %v73_v21 = vsel %vm72_vm2, %v71_v19, %v68_v20 }
  0x87   :  { %1438 = vmatmul.msk.f32.vlgmr.msra.gmra.mxu0 %vm88_vm3, %v73_v21  ;;  %v1487_v21 = vld [vmem:[%s2641_s7 + $0x3] ss:$0 sm:$0xff] }
 0x104   :  { %v109_v23 = vpop.f32.mrf.mxu0 }
 0x105   :  { %v110_v24 = vadd.f32 %v1484_v22, %v109_v23 }
 0x107   :  { %v112_v25 = vmax.f32 %v110_v24, 0.0 }
 0x109   :  { %v116_v26 = vsel %vm115_vm4, %v112_v25, 0.0 }
 0x10a   :  { %117 = vadd.xlane.f32.xlu1 %v116_v26 }
 0x17d   :  { %v118_v34 = vpop.xlane.xlu1 %117 }
 0x17e   :  { %v126_v35 = vmul.f32 %v1763_v33, %v118_v34 }
 0x180   :  { %v127_v36 = vsub.f32 %v112_v25, %v126_v35  ;;  %v278_v35 = vld [vmem:[%s2640_s6 + $0x138] sm:$0xff] }
 0x181   :  { %288 = vmatpush.msra.mxu3 %v278_v35 }
 0x182   :  { %v128_v37 = vmul.f32 %v127_v36, %v127_v36 }
 0x184   :  { %v129_v38 = vsel %vm115_vm4, %v128_v37, 0.0  ;;  %v276_v37 = vld [vmem:[%s2640_s6 + $0x128] sm:$0xff] }
 0x185   :  { %130 = vadd.xlane.f32.xlu1 %v129_v38  ;;  %v275_v38 = vld [vmem:[%s2640_s6 + $0x120] sm:$0xff] }
 0x1f8   :  { %v131_v39 = vpop.xlane.xlu1 %130 }
 0x1f9   :  { %v132_v40 = vmul.f32 %v131_v39, %v1763_v33 }
 0x1fb   :  { %v133_v44 = vadd.f32 1e-05, %v132_v40  ;;  %v274_v40 = vld [vmem:[%s2640_s6 + $0x118] sm:$0xff] }
 0x1fd   :  { %1528 = vrsqrt.f32 %v133_v44  ;;  %vm140_vm7 = vweird.f32 %v133_v44 }
 0x203   :  { %v1529_v54 = vpop.eup %1528 }
 0x204   :  { %v135_v56 = vmul.f32 %v1529_v54, %v133_v44  ;;  %vm141_vm6 = vweird.f32 %v1529_v54  ;;  %v272_v44 = vld [vmem:[%s2640_s6 + $0x108] sm:$0xff] }
 0x205   :  { %vm142_vm8 = vmor %vm140_vm7, %vm141_vm6 }
 0x206   :  { %v136_v59 = vmul.f32 %v1529_v54, %v135_v56  ;;  %v269_v56 = vld [vmem:[%s2640_s6 + $0xf0] sm:$0xff] }
 0x208   :  { %v137_v61 = vmul.f32 0.5, %v136_v59  ;;  %v1488_v59 = vld [vmem:[%s2641_s7 + $0x4] ss:$0 sm:$0xff] }
 0x20a   :  { %v138_v63 = vsub.f32 1.5, %v137_v61 }
 0x20c   :  { %v139_v1 = vmul.f32 %v1529_v54, %v138_v63 }
 0x20e   :  { %v143_v3 = vsel %vm142_vm8, %v1529_v54, %v139_v1  ;;  %v271_v54 = vld [vmem:[%s2640_s6 + $0x100] sm:$0xff] }
 0x20f   :  { %v144_v4 = vmul.f32 %v143_v3, %v127_v36  ;;  %v277_v36 = vld [vmem:[%s2640_s6 + $0x130] sm:$0xff]  ;;  %v1492_v3 = vld [vmem:[%s2641_s7 + $0x5] ss:$0 sm:$0xff] }
 0x210   :  { %289 = vmatpush.msra.mxu3 %v277_v36  ;;  %v372_v36 = vld [vmem:[%s2640_s6 + $0x180] sm:$0xff] }
 0x211   :  { %v146_v6 = vmul.f32 %v1485_v2, %v144_v4 }
 0x212   :  { %290 = vmatpush.msra.mxu3 %v276_v37 }
 0x213   :  { %v148_v7 = vadd.f32 %v1486_v5, %v146_v6 }
 0x214   :  { %291 = vmatpush.msra.mxu3 %v275_v38  ;;  %v451_v38 = vld [vmem:[%s2640_s6 + $0x518] sm:$0xff] }
 0x215   :  { %v150_v8 = vrot.slane %v148_v7, 6  ;;  %v152_v9 = vrot.slane %v148_v7, 4 }
 0x216   :  { %292 = vmatpush.msra.mxu3 %v274_v40  ;;  %v450_v40 = vld [vmem:[%s2640_s6 + $0x510] sm:$0xff] }
 0x217   :  { %v155_v10 = vsel %vm154_vm9, %v148_v7, %v150_v8 }
 0x218   :  { %v1830_v11 = vsel %vm156_vm10, %v155_v10, %v152_v9  ;;  %293 = vmatpush.msra.mxu3 %v273_v42 }
 0x219   :  { %159 = vrot.lane.b32.xlu2 %v1830_v11, %s1635_s16 }
 0x21a   :  { %294 = vmatpush.msra.mxu3 %v272_v44 }
 0x21c   :  { %295 = vmatpush.msra.mxu3 %v271_v54 }
 0x21e   :  { %296 = vmatpush.msra.mxu3 %v270_v55 }
 0x220   :  { %297 = vmatpush.msra.mxu3 %v269_v56 }
 0x222   :  { %298 = vmatpush.msra.mxu3 %v268_v57 }
 0x224   :  { %299 = vmatpush.msra.mxu3 %v267_v58 }
 0x273   :  { %v160_v19 = vpop.permute.xlu2 %159 }
 0x274   :  { %v162_v20 = vsel %vm70_vm1, %v1753_v18, %v160_v19  ;;  %v381_v19 = vld [vmem:[%s2640_s6 + $0x1c8] sm:$0xff] }
 0x275   :  { %1439 = vmatmul.msk.f32.vlgmr.msra.gmra.mxu1 %vm72_vm2, %v162_v20  ;;  %1440 = vmatmul.msk.f32.vlgmr.msra.gmra.mxu2 %vm72_vm2, %v162_v20 }
 0x276   :  { %395 = vmatpush.msrb.mxu2 %v381_v19 }
 0x27d   :  { %1442 = vmatmul.msk.f32.vlgmr.msrb.gmra.mxu1 %vm72_vm2, %v162_v20 }
 0x2f2   :  { %v193_v22 = vpop.f32.mrf.mxu1 }
 0x2f3   :  { %v194_v23 = vadd.f32 %v1487_v21, %v193_v22  ;;  %v380_v22 = vld [vmem:[%s2640_s6 + $0x1c0] sm:$0xff] }
 0x2f4   :  { %396 = vmatpush.msrb.mxu2 %v380_v22 }
 0x2f5   :  { %v1860_v24 = vmax.f32 %v194_v23, 0.0 }
 0x2f7   :  { %v200_v25 = vsel %vm199_vm11, %v1860_v24, 0.0 }
 0x2f8   :  { %201 = vadd.xlane.f32.xlu2 %v200_v25  ;;  %v253_v60 = vpop.f32.mrf.mxu2  ;;  %v378_v25 = vld [vmem:[%s2640_s6 + $0x1b0] sm:$0xff] }
 0x2f9   :  { %v254_v62 = vadd.f32 %v1488_v59, %v253_v60 }
 0x2fa   :  { %v362_v54 = vpop.f32.mrf.mxu1 }
 0x2fb   :  { %v256_v63 = vmax.f32 %v254_v62, 0.0  ;;  %v1495_v62 = vld [vmem:[%s2641_s7 + $0x9] ss:$0 sm:$0xff] }
 0x36b   :  { %v202_v26 = vpop.xlane.xlu2 %201 }
 0x36c   :  { %v203_v27 = vmul.f32 %v202_v26, %v1763_v33  ;;  %v377_v26 = vld [vmem:[%s2640_s6 + $0x1a8] sm:$0xff] }
 0x36e   :  { %v204_v28 = vsub.f32 %v1860_v24, %v203_v27  ;;  %v376_v27 = vld [vmem:[%s2640_s6 + $0x1a0] sm:$0xff] }
 0x370   :  { %v205_v29 = vmul.f32 %v204_v28, %v204_v28 }
 0x372   :  { %v206_v30 = vsel %vm199_vm11, %v205_v29, 0.0  ;;  %v375_v29 = vld [vmem:[%s2640_s6 + $0x198] sm:$0xff] }
 0x373   :  { %207 = vadd.xlane.f32.xlu0 %v206_v30 }
 0x387   :  { %440 = vrot.lane.b32.xlu0 %v1753_v18, %s1635_s16 }
 0x3e6   :  { %v208_v31 = vpop.xlane.xlu0 %207 }
 0x3e7   :  { %v209_v32 = vmul.f32 %v208_v31, %v1763_v33  ;;  %v374_v31 = vld [vmem:[%s2640_s6 + $0x190] sm:$0xff] }
 0x3e9   :  { %v210_v34 = vadd.f32 1e-05, %v209_v32 }
 0x3eb   :  { %1530 = vrsqrt.f32 %v210_v34  ;;  %vm217_vm13 = vweird.f32 %v210_v34 }
 0x3f1   :  { %v1531_v39 = vpop.eup %1530 }
 0x3f2   :  { %v212_v41 = vmul.f32 %v1531_v39, %v210_v34  ;;  %vm218_vm12 = vweird.f32 %v1531_v39  ;;  %v373_v34 = vld [vmem:[%s2640_s6 + $0x188] sm:$0xff] }
 0x3f3   :  { %vm219_vm14 = vmor %vm217_vm13, %vm218_vm12 }
 0x3f4   :  { %v213_v43 = vmul.f32 %v1531_v39, %v212_v41  ;;  %v1493_v41 = vld [vmem:[%s2641_s7 + $0xa] ss:$0 sm:$0xff] }
 0x3f6   :  { %v214_v45 = vmul.f32 0.5, %v213_v43  ;;  %v449_v43 = vld [vmem:[%s2640_s6 + $0x508] sm:$0xff] }
 0x3f8   :  { %v215_v46 = vsub.f32 1.5, %v214_v45  ;;  %v1494_v45 = vld [vmem:[%s2641_s7 + $0xb] ss:$0 sm:$0xff] }
 0x3f9   :  { %v441_v60 = vpop.permute.xlu0 %440 }
 0x3fa   :  { %v216_v47 = vmul.f32 %v1531_v39, %v215_v46 }
 0x3fc   :  { %v220_v49 = vsel %vm219_vm14, %v1531_v39, %v216_v47 }
 0x3fd   :  { %v221_v50 = vmul.f32 %v220_v49, %v204_v28  ;;  %v447_v49 = vld [vmem:[%s2640_s6 + $0x4f8] sm:$0xff] }
 0x3ff   :  { %v223_v52 = vmul.f32 %v1490_v48, %v221_v50  ;;  %v448_v48 = vld [vmem:[%s2640_s6 + $0x500] sm:$0xff]  ;;  %v446_v50 = vld [vmem:[%s2640_s6 + $0x4f0] sm:$0xff] }
 0x401   :  { %v225_v53 = vadd.f32 %v1491_v51, %v223_v52  ;;  %v445_v51 = vld [vmem:[%s2640_s6 + $0x4e8] sm:$0xff]  ;;  %v444_v52 = vld [vmem:[%s2640_s6 + $0x4e0] sm:$0xff] }
 0x403   :  { %258 = vrot.lane.b32.xlu1 %v225_v53, %s1635_s16  ;;  %v1489_v53 = vld [vmem:[%s2641_s7 + $0x8] ss:$0 sm:$0xff] }
 0x404   :  { %v363_v55 = vadd.f32 %v1489_v53, %v362_v54  ;;  %v683_v53 = vld [vmem:[%s2640_s6 + $0x2c8] sm:$0xff]  ;;  %v574_v54 = vld [vmem:[%s2640_s6 + $0x220] sm:$0xff] }
 0x406   :  { %v365_v56 = vmax.f32 %v363_v55, 0.0 }
 0x40b   :  { %262 = vrot.lane.b32.xlu1 %v1753_v18, %s1636_s15 }
 0x475   :  { %v259_v61 = vpop.permute.xlu1 %258 }
 0x476   :  { %v265_v0 = vsel %vm70_vm1, %v256_v63, %v259_v61  ;;  %v443_v61 = vsel %vm70_vm1, %v1830_v11, %v441_v60  ;;  %v793_v60 = vld [vmem:[%s2640_s6 + $0x550] sm:$0xff] }
 0x47d   :  { %v1919_v1 = vpop.permute.xlu1 %262 }
 0x47e   :  { %v266_v2 = vsel %vm72_vm2, %v265_v0, %v1919_v1 }
 0x47f   :  { %1441 = vmatmul.msk.f32.vlgmr.msra.gmra.mxu3 %vm88_vm3, %v266_v2 }
 0x502   :  { %v301_v4 = vpop.f32.mrf.mxu3 }
 0x503   :  { %v302_v5 = vadd.f32 %v1492_v3, %v301_v4 }
 0x505   :  { %v304_v6 = vmax.f32 %v302_v5, 0.0 }
 0x507   :  { %v305_v7 = vmul.f32 %v304_v6, %v256_v63 }
 0x509   :  { %v1928_v8 = vsub.f32 %v1860_v24, %v305_v7  ;;  %v379_v24 = vld [vmem:[%s2640_s6 + $0x1b8] sm:$0xff] }
 0x50a   :  { %397 = vmatpush.msrb.mxu2 %v379_v24 }
 0x50b   :  { %v309_v9 = vsel %vm199_vm11, %v1928_v8, 0.0 }
 0x50c   :  { %310 = vadd.xlane.f32.xlu1 %v309_v9  ;;  %398 = vmatpush.msrb.mxu2 %v378_v25  ;;  %v1497_v9 = vld [vmem:[%s2641_s7 + $0x25] ss:$0 sm:$0xff] }
 0x50e   :  { %399 = vmatpush.msrb.mxu2 %v377_v26  ;;  %v581_v26 = vld [vmem:[%s2640_s6 + $0x258] sm:$0xff] }
 0x50f   :  { %592 = vmatpush.msra.mxu1 %v581_v26 }
 0x510   :  { %400 = vmatpush.msrb.mxu2 %v376_v27  ;;  %v580_v27 = vld [vmem:[%s2640_s6 + $0x250] sm:$0xff] }
 0x511   :  { %593 = vmatpush.msra.mxu1 %v580_v27 }
 0x512   :  { %401 = vmatpush.msrb.mxu2 %v375_v29  ;;  %v689_v29 = vld [vmem:[%s2640_s6 + $0x2f8] sm:$0xff] }
 0x514   :  { %402 = vmatpush.msrb.mxu2 %v374_v31 }
 0x516   :  { %403 = vmatpush.msrb.mxu2 %v373_v34  ;;  %v518_v34 = vld [vmem:[%s2640_s6 + $0x210] sm:$0xff] }
 0x518   :  { %404 = vmatpush.msrb.mxu2 %v372_v36  ;;  %v517_v36 = vld [vmem:[%s2640_s6 + $0x208] sm:$0xff] }
 0x51a   :  { %465 = vmatpush.msra.mxu2 %v451_v38  ;;  %v578_v38 = vld [vmem:[%s2640_s6 + $0x240] sm:$0xff] }
 0x51c   :  { %466 = vmatpush.msra.mxu2 %v450_v40  ;;  %v686_v40 = vld [vmem:[%s2640_s6 + $0x2e0] sm:$0xff] }
 0x51e   :  { %467 = vmatpush.msra.mxu2 %v449_v43  ;;  %v515_v43 = vld [vmem:[%s2640_s6 + $0x1f8] sm:$0xff] }
 0x520   :  { %468 = vmatpush.msra.mxu2 %v448_v48 }
 0x522   :  { %469 = vmatpush.msra.mxu2 %v447_v49 }
 0x524   :  { %470 = vmatpush.msra.mxu2 %v446_v50  ;;  %v575_v50 = vld [vmem:[%s2640_s6 + $0x228] sm:$0xff] }
 0x526   :  { %471 = vmatpush.msra.mxu2 %v445_v51 }
 0x528   :  { %472 = vmatpush.msra.mxu2 %v444_v52  ;;  %v513_v52 = vld [vmem:[%s2640_s6 + $0x1e8] sm:$0xff] }
 0x57f   :  { %v311_v10 = vpop.xlane.xlu1 %310 }
 0x580   :  { %v312_v12 = vmul.f32 %v311_v10, %v1763_v33 }
 0x582   :  { %v313_v13 = vsub.f32 %v1928_v8, %v312_v12 }
 0x584   :  { %v314_v14 = vmul.f32 %v313_v13, %v313_v13 }
 0x586   :  { %v315_v15 = vsel %vm199_vm11, %v314_v14, 0.0 }
 0x587   :  { %316 = vadd.xlane.f32.xlu2 %v315_v15 }
 0x5fa   :  { %v317_v20 = vpop.xlane.xlu2 %316 }
 0x5fb   :  { %v318_v21 = vmul.f32 %v317_v20, %v1763_v33 }
 0x5fd   :  { %v319_v23 = vadd.f32 1e-05, %v318_v21 }
 0x5ff   :  { %1532 = vrsqrt.f32 %v319_v23  ;;  %vm326_vm0 = vweird.f32 %v319_v23 }
 0x605   :  { %v1533_v28 = vpop.eup %1532 }
 0x606   :  { %v321_v30 = vmul.f32 %v1533_v28, %v319_v23  ;;  %vm327_vm15 = vweird.f32 %v1533_v28 }
 0x607   :  { %vm328_vm5 = vmor %vm326_vm0, %vm327_vm15 }
 0x608   :  { %v322_v32 = vmul.f32 %v1533_v28, %v321_v30 }
 0x60a   :  { %v323_v35 = vmul.f32 0.5, %v322_v32  ;;  %v579_v32 = vld [vmem:[%s2640_s6 + $0x248] sm:$0xff] }
 0x60b   :  { %594 = vmatpush.msra.mxu1 %v579_v32 }
 0x60c   :  { %v324_v37 = vsub.f32 1.5, %v323_v35  ;;  %v688_v35 = vld [vmem:[%s2640_s6 + $0x2f0] sm:$0xff] }
 0x60d   :  { %595 = vmatpush.msra.mxu1 %v578_v38 }
 0x60e   :  { %v325_v39 = vmul.f32 %v1533_v28, %v324_v37  ;;  %v687_v37 = vld [vmem:[%s2640_s6 + $0x2e8] sm:$0xff] }
 0x610   :  { %v329_v42 = vsel %vm328_vm5, %v1533_v28, %v325_v39  ;;  %v519_v28 = vld [vmem:[%s2640_s6 + $0x218] sm:$0xff]  ;;  %v516_v39 = vld [vmem:[%s2640_s6 + $0x200] sm:$0xff] }
 0x611   :  { %v330_v44 = vmul.f32 %v329_v42, %v313_v13  ;;  %533 = vmatpush.msrb.mxu3 %v519_v28  ;;  %v577_v42 = vld [vmem:[%s2640_s6 + $0x238] sm:$0xff] }
 0x612   :  { %596 = vmatpush.msra.mxu1 %v577_v42  ;;  %v620_v42 = vld [vmem:[%s2640_s6 + $0x290] sm:$0xff] }
 0x613   :  { %v332_v46 = vmul.f32 %v1493_v41, %v330_v44  ;;  %534 = vmatpush.msrb.mxu3 %v518_v34  ;;  %v685_v44 = vld [vmem:[%s2640_s6 + $0x2d8] sm:$0xff] }
 0x615   :  { %v334_v47 = vadd.f32 %v1494_v45, %v332_v46  ;;  %535 = vmatpush.msrb.mxu3 %v517_v36  ;;  %v576_v45 = vld [vmem:[%s2640_s6 + $0x230] sm:$0xff] }
 0x616   :  { %v514_v46 = vld [vmem:[%s2640_s6 + $0x1f0] sm:$0xff]  ;;  %597 = vmatpush.msra.mxu1 %v576_v45 }
 0x617   :  { %367 = vrot.lane.b32.xlu2 %v334_v47, %s1635_s16  ;;  %536 = vmatpush.msrb.mxu3 %v516_v39  ;;  %v684_v47 = vld [vmem:[%s2640_s6 + $0x2d0] sm:$0xff]  ;;  %v622_v39 = vld [vmem:[%s2640_s6 + $0x2a0] sm:$0xff] }
 0x618   :  { %598 = vmatpush.msra.mxu1 %v575_v50  ;;  %v624_v36 = vld [vmem:[%s2640_s6 + $0x2b0] sm:$0xff]  ;;  %v615_v50 = vld [vmem:[%s2640_s6 + $0x268] sm:$0xff] }
 0x619   :  { %537 = vmatpush.msrb.mxu3 %v515_v43  ;;  %v619_v43 = vld [vmem:[%s2640_s6 + $0x288] sm:$0xff] }
 0x61a   :  { %599 = vmatpush.msra.mxu1 %v574_v54  ;;  %v1504_v54 = vld [vmem:[%s2641_s7 + $0x11] ss:$0 sm:$0xff] }
 0x61b   :  { %538 = vmatpush.msrb.mxu3 %v514_v46  ;;  %v617_v46 = vld [vmem:[%s2640_s6 + $0x278] sm:$0xff] }
 0x61d   :  { %539 = vmatpush.msrb.mxu3 %v513_v52 }
 0x671   :  { %v368_v57 = vpop.permute.xlu2 %367 }
 0x672   :  { %v370_v58 = vsel %vm70_vm1, %v365_v56, %v368_v57 }
 0x673   :  { %v371_v59 = vsel %vm72_vm2, %v370_v58, %v1919_v1  ;;  %v1496_v1 = vld [vmem:[%s2641_s7 + $0x24] ss:$0 sm:$0xff] }
 0x674   :  { %1443 = vmatmul.msk.f32.vlgmr.msrb.gmra.mxu2 %vm88_vm3, %v371_v59 }
 0x675   :  { %700 = vmatpush.msrb.mxu2 %v689_v29 }
 0x677   :  { %701 = vmatpush.msrb.mxu2 %v688_v35  ;;  %v625_v35 = vld [vmem:[%s2640_s6 + $0x2b8] sm:$0xff] }
 0x678   :  { %635 = vmatpush.msrb.mxu0 %v625_v35  ;;  %v730_v35 = vld [vmem:[%s2640_s6 + $0x358] sm:$0xff] }
 0x679   :  { %702 = vmatpush.msrb.mxu2 %v687_v37 }
 0x67a   :  { %636 = vmatpush.msrb.mxu0 %v624_v36  ;;  %v729_v36 = vld [vmem:[%s2640_s6 + $0x350] sm:$0xff] }
 0x67b   :  { %703 = vmatpush.msrb.mxu2 %v686_v40 }
 0x67c   :  { %1444 = vmatmul.msk.f32.vlgmr.msra.gmra.mxu2 %vm72_vm2, %v443_v61 }
 0x67d   :  { %704 = vmatpush.msrb.mxu2 %v685_v44  ;;  %v618_v44 = vld [vmem:[%s2640_s6 + $0x280] sm:$0xff] }
 0x67f   :  { %705 = vmatpush.msrb.mxu2 %v684_v47 }
 0x681   :  { %706 = vmatpush.msrb.mxu2 %v683_v53 }
 0x6f7   :  { %v406_v63 = vpop.f32.mrf.mxu2 }
 0x6f8   :  { %v407_v0 = vadd.f32 %v1495_v62, %v406_v63  ;;  %v792_v63 = vld [vmem:[%s2640_s6 + $0x548] sm:$0xff] }
 0x6fa   :  { %v409_v2 = vmax.f32 %v407_v0, 0.0 }
 0x6fc   :  { %v410_v3 = vmul.f32 %v409_v2, %v365_v56  ;;  %v794_v56 = vld [vmem:[%s2640_s6 + $0x558] sm:$0xff] }
 0x6fd   :  { %805 = vmatpush.msrb.mxu1 %v794_v56 }
 0x6fe   :  { %v411_v4 = vsub.f32 %v1928_v8, %v410_v3 }
 0x6ff   :  { %v474_v5 = vpop.f32.mrf.mxu2  ;;  %806 = vmatpush.msrb.mxu1 %v793_v60  ;;  %v614_v60 = vld [vmem:[%s2640_s6 + $0x260] sm:$0xff] }
 0x700   :  { %v475_v6 = vadd.f32 %v1496_v1, %v474_v5  ;;  %v414_v7 = vsel %vm199_vm11, %v411_v4, 0.0  ;;  %v1498_v1 = vld [vmem:[%s2641_s7 + $0xc] ss:$0 sm:$0xff] }
 0x701   :  { %415 = vadd.xlane.f32.xlu0 %v414_v7  ;;  %807 = vmatpush.msrb.mxu1 %v792_v63  ;;  %v1499_v7 = vld [vmem:[%s2641_s7 + $0xd] ss:$0 sm:$0xff] }
 0x702   :  { %v477_v10 = vmax.f32 %v475_v6, 0.0 }
 0x704   :  { %v480_v12 = vmul.f32 %v1497_v9, %v477_v10 }
 0x706   :  { %v481_v13 = vsel %vm199_vm11, %v480_v12, 0.0 }
 0x707   :  { %482 = vadd.xlane.f32.xlu2 %v481_v13 }
 0x774   :  { %v416_v14 = vpop.xlane.xlu0 %415 }
 0x775   :  { %v417_v15 = vmul.f32 %v416_v14, %v1763_v33 }
 0x777   :  { %v2026_v16 = vsub.f32 %v411_v4, %v417_v15 }
 0x779   :  { %v419_v8 = vmul.f32 %v2026_v16, %v2026_v16 }
 0x77a   :  { %v483_v19 = vpop.xlane.xlu2 %482 }
 0x77b   :  { %v420_v17 = vsel %vm199_vm11, %v419_v8, 0.0  ;;  %v1445_v20 = vmul.f32 -1.442695, %v483_v19  ;;  %v512_v8 = vld [vmem:[%s2640_s6 + $0x1e0] sm:$0xff]  ;;  %v789_v19 = vld [vmem:[%s2640_s6 + $0x530] sm:$0xff] }
 0x77c   :  { %421 = vadd.xlane.f32.xlu1 %v420_v17  ;;  %v791_v17 = vld [vmem:[%s2640_s6 + $0x540] sm:$0xff]  ;;  %540 = vmatpush.msrb.mxu3 %v512_v8 }
 0x77d   :  { %1534 = vpow2.f32 %v1445_v20  ;;  %808 = vmatpush.msrb.mxu1 %v791_v17  ;;  %v788_v20 = vld [vmem:[%s2640_s6 + $0x528] sm:$0xff] }
 0x77e   :  { %740 = vmatpush.msra.mxu3 %v730_v35 }
 0x780   :  { %741 = vmatpush.msra.mxu3 %v729_v36  ;;  %v2333_v36 = vld [vmem:[%s2638_s4 + $0x8] sm:$0xff] }
 0x783   :  { %v1535_v21 = vpop.eup %1534 }
 0x784   :  { %v2031_v22 = vadd.f32 1.0, %v1535_v21  ;;  %v787_v21 = vld [vmem:[%s2640_s6 + $0x520] sm:$0xff] }
 0x786   :  { %1536 = vrcp.f32 %v2031_v22  ;;  %v499_v59 = vand.u32 2147483648, %v2031_v22  ;;  %vm493_vm7 = vweird.f32 %v2031_v22  ;;  %v497_v61 = vand.u32 2147483647, %v2031_v22 }
 0x788   :  { %v500_v3 = vor.u32 1.1754944e-38, %v499_v59  ;;  %vm498_vm15 = vcmp.eq.f32.partialorder %v497_v61, 8.507059e+37  ;;  %v1500_v61 = vld [vmem:[%s2641_s7 + $0xf] ss:$0 sm:$0xff] }
 0x78c   :  { %v2034_v23 = vpop.eup %1536 }
 0x78d   :  { %v489_v30 = vmul.f32 %v2034_v23, %v2031_v22  ;;  %vm494_vm6 = vweird.f32 %v2034_v23 }
 0x78e   :  { %vm495_vm12 = vmor %vm493_vm7, %vm494_vm6 }
 0x78f   :  { %v490_v41 = vsub.f32 1.0, %v489_v30 }
 0x791   :  { %v491_v49 = vmul.f32 %v2034_v23, %v490_v41  ;;  %v621_v41 = vld [vmem:[%s2640_s6 + $0x298] sm:$0xff] }
 0x793   :  { %v492_v57 = vadd.f32 %v2034_v23, %v491_v49 }
 0x795   :  { %v496_v0 = vsel %vm495_vm12, %v2034_v23, %v492_v57  ;;  %v1505_v57 = vld [vmem:[%s2641_s7 + $0x12] ss:$0 sm:$0xff] }
 0x796   :  { %v501_v5 = vsel %vm498_vm15, %v500_v3, %v496_v0  ;;  %vm849_vm15 = vcmask 15360  }
 0x797   :  { %v503_v10 = vsub.f32 1.0, %v501_v5 }
 0x799   :  { %v504_v13 = vmul.f32 %v503_v10, %v1753_v18  ;;  %v790_v18 = vld [vmem:[%s2640_s6 + $0x538] sm:$0xff] }
 0x79a   :  { %809 = vmatpush.msrb.mxu1 %v790_v18 }
 0x79c   :  { %810 = vmatpush.msrb.mxu1 %v789_v19 }
 0x79e   :  { %811 = vmatpush.msrb.mxu1 %v788_v20 }
 0x7a0   :  { %812 = vmatpush.msrb.mxu1 %v787_v21 }
 0x7ef   :  { %v422_v24 = vpop.xlane.xlu1 %421 }
 0x7f0   :  { %v423_v25 = vmul.f32 %v422_v24, %v1763_v33  ;;  %v1501_v24 = vld [vmem:[%s2641_s7 + $0xe] ss:$0 sm:$0xff] }
 0x7f2   :  { %v2051_v31 = vadd.f32 1e-05, %v423_v25 }
 0x7f4   :  { %1538 = vrsqrt.f32 %v2051_v31  ;;  %vm431_vm13 = vweird.f32 %v2051_v31 }
 0x7fa   :  { %v1539_v48 = vpop.eup %1538 }
 0x7fb   :  { %v426_v51 = vmul.f32 %v1539_v48, %v2051_v31  ;;  %vm432_vm8 = vweird.f32 %v1539_v48 }
 0x7fc   :  { %vm433_vm14 = vmor %vm431_vm13, %vm432_vm8  ;;  %vm824_vm13 = vcmask 1045504  }
 0x7fd   :  { %v427_v55 = vmul.f32 %v1539_v48, %v426_v51 }
 0x7ff   :  { %v428_v58 = vmul.f32 0.5, %v427_v55 }
 0x801   :  { %v429_v62 = vsub.f32 1.5, %v428_v58 }
 0x803   :  { %v430_v2 = vmul.f32 %v1539_v48, %v429_v62 }
 0x805   :  { %v434_v4 = vsel %vm433_vm14, %v1539_v48, %v430_v2  ;;  %v616_v48 = vld [vmem:[%s2640_s6 + $0x270] sm:$0xff] }
 0x806   :  { %v435_v6 = vmul.f32 %v434_v4, %v2026_v16  ;;  %v682_v16 = vld [vmem:[%s2640_s6 + $0x2c0] sm:$0xff] }
 0x807   :  { %707 = vmatpush.msrb.mxu2 %v682_v16 }
 0x808   :  { %v437_v9 = vmul.f32 %v1498_v1, %v435_v6 }
 0x80a   :  { %v439_v12 = vadd.f32 %v1499_v7, %v437_v9 }
 0x80c   :  { %v505_v14 = vmul.f32 %v501_v5, %v439_v12  ;;  %v1506_v5 = vld [vmem:[%s2641_s7 + $0x10] ss:$0 sm:$0xff] }
 0x80e   :  { %v2134_v15 = vadd.f32 %v505_v14, %v504_v13 }
 0x810   :  { %508 = vrot.lane.b32.xlu1 %v2134_v15, %s1635_s16 }
 0x882   :  { %v509_v22 = vpop.permute.xlu1 %508 }
 0x883   :  { %v511_v23 = vsel %vm70_vm1, %v1830_v11, %v509_v22 }
 0x884   :  { %1446 = vmatmul.msk.f32.vlgmr.msrb.gmra.mxu3 %vm72_vm2, %v511_v23  ;;  %1447 = vmatmul.msk.f32.vlgmr.msra.gmra.mxu1 %vm72_vm2, %v511_v23 }
 0x885   :  { %1449 = vmatmul.msk.f32.vlgmr.msrb.gmra.mxu2 %vm72_vm2, %v511_v23 }
 0x88c   :  { %1451 = vmatmul.msk.f32.vlgmr.msrb.gmra.mxu1 %vm72_vm2, %v511_v23 }
 0x901   :  { %v601_v62 = vpop.f32.mrf.mxu1 }
 0x902   :  { %v602_v63 = vadd.f32 %v1500_v61, %v601_v62 }
 0x904   :  { %v604_v0 = vmax.f32 %v602_v63, 0.0 }
 0x907   :  { %v542_v25 = vpop.f32.mrf.mxu3 }
 0x908   :  { %v543_v26 = vadd.f32 %v1501_v24, %v542_v25 }
 0x90a   :  { %v2168_v27 = vmax.f32 %v543_v26, 0.0 }
 0x90c   :  { %v548_v28 = vsel %vm199_vm11, %v2168_v27, 0.0 }
 0x90d   :  { %549 = vadd.xlane.f32.xlu0 %v548_v28  ;;  %v1507_v28 = vld [vmem:[%s2641_s7 + $0x15] ss:$0 sm:$0xff] }
 0x921   :  { %609 = vrot.lane.b32.xlu0 %v1830_v11, %s1636_s15  ;;  %v623_v11 = vld [vmem:[%s2640_s6 + $0x2a8] sm:$0xff] }
 0x922   :  { %637 = vmatpush.msrb.mxu0 %v623_v11  ;;  %v728_v11 = vld [vmem:[%s2640_s6 + $0x348] sm:$0xff] }
 0x923   :  { %742 = vmatpush.msra.mxu3 %v728_v11 }
 0x924   :  { %638 = vmatpush.msrb.mxu0 %v622_v39  ;;  %v725_v39 = vld [vmem:[%s2640_s6 + $0x330] sm:$0xff] }
 0x926   :  { %639 = vmatpush.msrb.mxu0 %v621_v41  ;;  %v724_v41 = vld [vmem:[%s2640_s6 + $0x328] sm:$0xff] }
 0x928   :  { %640 = vmatpush.msrb.mxu0 %v620_v42  ;;  %v814_v42 = vpop.f32.mrf.mxu1 }
 0x92a   :  { %641 = vmatpush.msrb.mxu0 %v619_v43  ;;  %v723_v43 = vld [vmem:[%s2640_s6 + $0x320] sm:$0xff] }
 0x92c   :  { %642 = vmatpush.msrb.mxu0 %v618_v44 }
 0x92e   :  { %643 = vmatpush.msrb.mxu0 %v617_v46  ;;  %v721_v46 = vld [vmem:[%s2640_s6 + $0x310] sm:$0xff] }
 0x930   :  { %644 = vmatpush.msrb.mxu0 %v616_v48  ;;  %v1509_v48 = vld [vmem:[%s2641_s7 + $0x27] ss:$0 sm:$0xff] }
 0x932   :  { %645 = vmatpush.msrb.mxu0 %v615_v50 }
 0x934   :  { %646 = vmatpush.msrb.mxu0 %v614_v60 }
 0x980   :  { %v550_v29 = vpop.xlane.xlu0 %549 }
 0x981   :  { %v551_v30 = vmul.f32 %v550_v29, %v1763_v33 }
 0x983   :  { %v552_v31 = vsub.f32 %v2168_v27, %v551_v30 }
 0x985   :  { %v553_v32 = vmul.f32 %v552_v31, %v552_v31 }
 0x987   :  { %v554_v34 = vsel %vm199_vm11, %v553_v32, 0.0 }
 0x988   :  { %555 = vadd.xlane.f32.xlu2 %v554_v34 }
 0x993   :  { %v2224_v3 = vpop.permute.xlu0 %609 }
 0x9fb   :  { %v556_v37 = vpop.xlane.xlu2 %555 }
 0x9fc   :  { %v557_v38 = vmul.f32 %v556_v37, %v1763_v33  ;;  %v727_v37 = vld [vmem:[%s2640_s6 + $0x340] sm:$0xff] }
 0x9fd   :  { %743 = vmatpush.msra.mxu3 %v727_v37 }
 0x9fe   :  { %v558_v40 = vadd.f32 1e-05, %v557_v38  ;;  %v726_v38 = vld [vmem:[%s2640_s6 + $0x338] sm:$0xff] }
 0x9ff   :  { %744 = vmatpush.msra.mxu3 %v726_v38 }
 0xa00   :  { %1540 = vrsqrt.f32 %v558_v40  ;;  %vm565_vm5 = vweird.f32 %v558_v40 }
 0xa01   :  { %745 = vmatpush.msra.mxu3 %v725_v39 }
 0xa03   :  { %746 = vmatpush.msra.mxu3 %v724_v41 }
 0xa05   :  { %747 = vmatpush.msra.mxu3 %v723_v43 }
 0xa06   :  { %v1541_v45 = vpop.eup %1540 }
 0xa07   :  { %v560_v47 = vmul.f32 %v1541_v45, %v558_v40  ;;  %vm566_vm0 = vweird.f32 %v1541_v45  ;;  %v1503_v40 = vld [vmem:[%s2641_s7 + $0x26] ss:$0 sm:$0xff] }
 0xa08   :  { %vm567_vm6 = vmor %vm565_vm5, %vm566_vm0  ;;  %v815_v44 = vadd.f32 %v1503_v40, %v814_v42  ;;  %vm851_vm0 = vcmask 31744   ;;  %vm854_vm5 = vcmask 48128   ;;  %v1511_v42 = vld [vmem:[%s2641_s7 + $0x17] ss:$0 sm:$0xff] }
 0xa09   :  { %v561_v49 = vmul.f32 %v1541_v45, %v560_v47  ;;  %v720_v47 = vld [vmem:[%s2640_s6 + $0x308] sm:$0xff] }
 0xa0b   :  { %v562_v51 = vmul.f32 0.5, %v561_v49 }
 0xa0d   :  { %v563_v52 = vsub.f32 1.5, %v562_v51 }
 0xa0f   :  { %v564_v53 = vmul.f32 %v1541_v45, %v563_v52  ;;  %v719_v52 = vld [vmem:[%s2640_s6 + $0x300] sm:$0xff] }
 0xa11   :  { %v568_v55 = vsel %vm567_vm6, %v1541_v45, %v564_v53  ;;  %v722_v45 = vld [vmem:[%s2640_s6 + $0x318] sm:$0xff]  ;;  %v1502_v53 = vld [vmem:[%s2641_s7 + $0x13] ss:$0 sm:$0xff] }
 0xa12   :  { %v569_v56 = vmul.f32 %v568_v55, %v552_v31  ;;  %v1508_v31 = vld [vmem:[%s2641_s7 + $0x16] ss:$0 sm:$0xff]  ;;  %748 = vmatpush.msra.mxu3 %v722_v45 }
 0xa14   :  { %v571_v58 = vmul.f32 %v1504_v54, %v569_v56  ;;  %749 = vmatpush.msra.mxu3 %v721_v46  ;;  %v709_v54 = vpop.f32.mrf.mxu2 }
 0xa15   :  { %v710_v55 = vadd.f32 %v1502_v53, %v709_v54  ;;  %v948_v53 = vld [vmem:[%s2640_s6 + $0x580] sm:$0xff] }
 0xa16   :  { %v573_v59 = vadd.f32 %v1505_v57, %v571_v58  ;;  %750 = vmatpush.msra.mxu3 %v720_v47 }
 0xa17   :  { %v712_v56 = vmax.f32 %v710_v55, 0.0  ;;  %v947_v55 = vld [vmem:[%s2640_s6 + $0x578] sm:$0xff] }
 0xa18   :  { %606 = vrot.lane.b32.xlu1 %v573_v59, %s1635_s16  ;;  %751 = vmatpush.msra.mxu3 %v719_v52  ;;  %v949_v52 = vld [vmem:[%s2640_s6 + $0x588] sm:$0xff] }
 0xa8a   :  { %v607_v2 = vpop.permute.xlu1 %606 }
 0xa8b   :  { %v612_v1 = vsel %vm70_vm1, %v604_v0, %v607_v2 }
 0xa8c   :  { %v613_v4 = vsel %vm72_vm2, %v612_v1, %v2224_v3 }
 0xa8d   :  { %1448 = vmatmul.msk.f32.vlgmr.msrb.gmra.mxu0 %vm88_vm3, %v613_v4 }
 0xb0a   :  { %v648_v6 = vpop.f32.mrf.mxu0 }
 0xb0b   :  { %v649_v7 = vadd.f32 %v1506_v5, %v648_v6 }
 0xb0d   :  { %v651_v9 = vmax.f32 %v649_v7, 0.0 }
 0xb0f   :  { %v652_v10 = vmul.f32 %v651_v9, %v604_v0 }
 0xb11   :  { %v2234_v12 = vsub.f32 %v2168_v27, %v652_v10 }
 0xb13   :  { %v656_v13 = vsel %vm199_vm11, %v2234_v12, 0.0 }
 0xb14   :  { %657 = vadd.xlane.f32.xlu2 %v656_v13  ;;  %v1638_v13 = vmov 0.0  }
 0xb87   :  { %v658_v14 = vpop.xlane.xlu2 %657 }
 0xb88   :  { %v659_v8 = vmul.f32 %v658_v14, %v1763_v33 }
 0xb8a   :  { %v660_v16 = vsub.f32 %v2234_v12, %v659_v8  ;;  %v1510_v8 = vld [vmem:[%s2641_s7 + $0x14] ss:$0 sm:$0xff] }
 0xb8c   :  { %v661_v17 = vmul.f32 %v660_v16, %v660_v16 }
 0xb8e   :  { %v662_v18 = vsel %vm199_vm11, %v661_v17, 0.0 }
 0xb8f   :  { %663 = vadd.xlane.f32.xlu1 %v662_v18 }
 0xc02   :  { %v664_v19 = vpop.xlane.xlu1 %663 }
 0xc03   :  { %v665_v20 = vmul.f32 %v664_v19, %v1763_v33 }
 0xc05   :  { %v666_v21 = vadd.f32 1e-05, %v665_v20 }
 0xc07   :  { %1542 = vrsqrt.f32 %v666_v21  ;;  %vm673_vm8 = vweird.f32 %v666_v21 }
 0xc08   :  { %1544 = vtanh.f32 %v815_v44  ;;  %v1512_v44 = vld [vmem:[%s2641_s7 + $0x18] ss:$0 sm:$0xff] }
 0xc0d   :  { %v1543_v22 = vpop.eup %1542 }
 0xc0e   :  { %v668_v23 = vmul.f32 %v1543_v22, %v666_v21  ;;  %vm674_vm7 = vweird.f32 %v1543_v22  ;;  %v1545_v49 = vpop.eup %1544 }
 0xc0f   :  { %vm675_vm12 = vmor %vm673_vm8, %vm674_vm7  ;;  %v820_v50 = vmul.f32 %v1545_v49, %v1509_v48 }
 0xc10   :  { %v669_v24 = vmul.f32 %v1543_v22, %v668_v23 }
 0xc11   :  { %v821_v51 = vsel %vm199_vm11, %v820_v50, 0.0  ;;  %v951_v50 = vld [vmem:[%s2640_s6 + $0x598] sm:$0xff] }
 0xc12   :  { %v670_v25 = vmul.f32 0.5, %v669_v24  ;;  %968 = vmatpush.msra.mxu1 %v951_v50 }
 0xc14   :  { %v671_v26 = vsub.f32 1.5, %v670_v25 }
 0xc16   :  { %v672_v27 = vmul.f32 %v1543_v22, %v671_v26 }
 0xc18   :  { %v676_v29 = vsel %vm675_vm12, %v1543_v22, %v672_v27 }
 0xc19   :  { %v677_v30 = vmul.f32 %v676_v29, %v660_v16 }
 0xc1b   :  { %v679_v32 = vmul.f32 %v1507_v28, %v677_v30 }
 0xc1d   :  { %v681_v34 = vadd.f32 %v1508_v31, %v679_v32  ;;  %v2326_v32 = vld [vmem:[%s2638_s4] sm:$0xff] }
 0xc1f   :  { %714 = vrot.lane.b32.xlu2 %v681_v34, %s1635_s16  ;;  %v1643_v34 = vmov 0  }
 0xc20   :  { %1481 = vset.pattern.permute.xlu2 %v1643_v34  ;;  %1483 = vset.pattern.permute.xlu0 %v1643_v34 }
 0xc21   :  { %1482 = vset.pattern.permute.xlu1 %v1643_v34 }
 0xc48   :  { %822 = vadd.xlane.f32.xlu2 %v821_v51  ;;  %v950_v51 = vld [vmem:[%s2640_s6 + $0x590] sm:$0xff] }
 0xc49   :  { %969 = vmatpush.msra.mxu1 %v950_v51 }
 0xc4b   :  { %970 = vmatpush.msra.mxu1 %v949_v52 }
 0xc4d   :  { %971 = vmatpush.msra.mxu1 %v948_v53 }
 0xc4f   :  { %972 = vmatpush.msra.mxu1 %v947_v55 }
 0xc79   :  { %v715_v57 = vpop.permute.xlu2 %714 }
 0xc7a   :  { %v717_v58 = vsel %vm70_vm1, %v712_v56, %v715_v57  ;;  %v945_v57 = vld [vmem:[%s2640_s6 + $0x568] sm:$0xff] }
 0xc7b   :  { %v718_v59 = vsel %vm72_vm2, %v717_v58, %v2224_v3  ;;  %v835_v3 = vlaneseq  ;;  %v944_v58 = vld [vmem:[%s2640_s6 + $0x560] sm:$0xff] }
 0xc7c   :  { %1450 = vmatmul.msk.f32.vlgmr.msra.gmra.mxu3 %vm88_vm3, %v718_v59 }
 0xc7d   :  { %v836_v9 = vshrl.u32 %v835_v3, 7  ;;  %v838_v10 = vand.u32 127, %v835_v3 }
 0xc7f   :  { %vm839_vm14 = vcmp.eq.s32.totalorder %v836_v9, %v838_v10 }
 0xc80   :  { %v2304_v14 = vsel %vm839_vm14, 1.0, %v1638_v13 }
 0xc81   :  { %843 = vrot.lane.b32.xlu1 %v2304_v14, %s1639_s26 }
 0xcbb   :  { %v823_v60 = vpop.xlane.xlu2 %822 }
 0xcbc   :  { %v825_v61 = vsel %vm824_vm13, %v823_v60, -inf }
 0xcbd   :  { %v826_v62 = vrot.slane %v825_v61, 4 }
 0xcbf   :  { %v827_v63 = vmax.f32 %v825_v61, %v826_v62 }
 0xcc1   :  { %v828_v0 = vrot.slane %v827_v63, 2 }
 0xcc3   :  { %v829_v2 = vmax.f32 %v827_v63, %v828_v0 }
 0xcc5   :  { %v830_v1 = vrot.slane %v829_v2, 1 }
 0xcc7   :  { %v831_v4 = vmax.f32 %v829_v2, %v830_v1 }
 0xcc9   :  { %v832_v5 = vsub.f32 %v823_v60, %v831_v4 }
 0xccb   :  { %v833_v6 = vmul.f32 1.442695, %v832_v5 }
 0xccd   :  { %1546 = vpow2.f32 %v833_v6 }
 0xcd3   :  { %v2300_v7 = vpop.eup %1546 }
 0xcd4   :  { %1455 = vmatpush.msk.msra.mxu0 %vm824_vm13, %v2300_v7 }
 0xcf3   :  { %v844_v27 = vpop.permute.xlu1 %843 }
 0xcf4   :  { %v850_v28 = vsel %vm849_vm15, %v2304_v14, %v844_v27 }
 0xcff   :  { %v753_v16 = vpop.f32.mrf.mxu3 }
 0xd00   :  { %v754_v17 = vadd.f32 %v1510_v8, %v753_v16 }
 0xd02   :  { %v756_v18 = vmax.f32 %v754_v17, 0.0 }
 0xd04   :  { %v757_v19 = vmul.f32 %v756_v18, %v712_v56  ;;  %v946_v56 = vld [vmem:[%s2640_s6 + $0x570] sm:$0xff] }
 0xd05   :  { %973 = vmatpush.msra.mxu1 %v946_v56 }
 0xd06   :  { %v758_v20 = vsub.f32 %v2234_v12, %v757_v19 }
 0xd07   :  { %974 = vmatpush.msra.mxu1 %v945_v57 }
 0xd08   :  { %v761_v21 = vsel %vm199_vm11, %v758_v20, 0.0 }
 0xd09   :  { %762 = vadd.xlane.f32.xlu0 %v761_v21  ;;  %975 = vmatpush.msra.mxu1 %v944_v58 }
 0xd1d   :  { %846 = vrot.lane.b32.xlu0 %v2304_v14, %s1640_s28 }
 0xd25   :  { %936 = vrot.lane.b32.xlu0 %v2326_v32, %s1635_s16 }
 0xd2d   :  { %938 = vrot.lane.b32.xlu0 %v2333_v36, %s1635_s16 }
 0xd7c   :  { %v763_v22 = vpop.xlane.xlu0 %762 }
 0xd7d   :  { %v764_v23 = vmul.f32 %v763_v22, %v1763_v33 }
 0xd7f   :  { %v765_v24 = vsub.f32 %v758_v20, %v764_v23 }
 0xd81   :  { %v766_v25 = vmul.f32 %v765_v24, %v765_v24 }
 0xd83   :  { %v767_v26 = vsel %vm199_vm11, %v766_v25, 0.0 }
 0xd84   :  { %768 = vadd.xlane.f32.xlu1 %v767_v26 }
 0xd8f   :  { %v847_v12 = vpop.permute.xlu0 %846 }
 0xd90   :  { %v2316_v29 = vsel %vm851_vm0, %v850_v28, %v847_v12  ;;  %vm1033_vm0 = vcmask 64512  }
 0xd91   :  { %1456 = vmatmul.msk.f32.vlgmr.msra.gmra.mxu0 %vm854_vm5, %v2316_v29 }
 0xd97   :  { %v937_v3 = vpop.permute.xlu0 %936 }
 0xd9d   :  { %1017 = vrot.lane.b32.xlu1 %v2304_v14, %s1641_s29 }
 0xd9f   :  { %v939_v20 = vpop.permute.xlu0 %938 }
 0xda5   :  { %1020 = vrot.lane.b32.xlu1 %v2304_v14, %s1642_s30 }
 0xdad   :  { %1029 = vrot.lane.b32.xlu1 %v2304_v14, %s1644_s10  ;;  %s1418_s10 = sshll.u32 %s2643_s9, 4  ;;  %s1419_s10 = int_to_ptr.hbm [resolvable:$true] %s1418_s10 }
 0xdf7   :  { %v769_v30 = vpop.xlane.xlu1 %768 }
 0xdf8   :  { %v770_v31 = vmul.f32 %v769_v30, %v1763_v33 }
 0xdfa   :  { %v771_v35 = vadd.f32 1e-05, %v770_v31 }
 0xdfc   :  { %1548 = vrsqrt.f32 %v771_v35  ;;  %vm778_vm6 = vweird.f32 %v771_v35 }
 0xe02   :  { %v1549_v11 = vpop.eup %1548 }
 0xe03   :  { %v773_v37 = vmul.f32 %v1549_v11, %v771_v35  ;;  %vm779_vm11 = vweird.f32 %v1549_v11  ;;  %v995_v35 = vld [vmem:[%s2639_s5] sm:$0xff] }
 0xe04   :  { %vm780_vm7 = vmor %vm778_vm6, %vm779_vm11  ;;  %vm1035_vm11 = vcmask 80896   ;;  %vm1037_vm6 = vcmask 97280  }
 0xe05   :  { %v774_v38 = vmul.f32 %v1549_v11, %v773_v37 }
 0xe07   :  { %v775_v39 = vmul.f32 0.5, %v774_v38 }
 0xe09   :  { %v776_v40 = vsub.f32 1.5, %v775_v39 }
 0xe0b   :  { %v777_v41 = vmul.f32 %v1549_v11, %v776_v40 }
 0xe0d   :  { %v781_v43 = vsel %vm780_vm7, %v1549_v11, %v777_v41  ;;  %v996_v11 = vld [vmem:[%s2639_s5 + $0x8] sm:$0xff]  ;;  %vm1039_vm7 = vcmask 113664  }
 0xe0e   :  { %v782_v45 = vmul.f32 %v781_v43, %v765_v24  ;;  %v901_v46 = vpop.f32.mrf.mxu0  ;;  %v1514_v24 = vld [vmem:[%s2641_s7 + $0x29] ss:$0 sm:$0xff] }
 0xe0f   :  { %906 = vperm.xlu2 %1481, %v901_v46   ;;  %v1018_v46 = vpop.permute.xlu1 %1017 }
 0xe10   :  { %v784_v47 = vmul.f32 %v1511_v42, %v782_v45  ;;  %v1032_v56 = vsel %vm854_vm5, %v2316_v29, %v1018_v46 }
 0xe12   :  { %v786_v48 = vadd.f32 %v1512_v44, %v784_v47 }
 0xe14   :  { %v853_v49 = vmul.f32 %v2300_v7, %v786_v48 }
 0xe16   :  { %1453 = vmatpush.msk.msra.mxu2 %vm824_vm13, %v853_v49 }
 0xe17   :  { %1454 = vmatmul.msk.f32.vlgmr.msra.gmra.mxu2 %vm854_vm5, %v2316_v29 }
 0xe69   :  { %v907_v54 = vpop.permute.xlu2 %906 }
 0xe6a   :  { %1550 = vrcp.f32 %v907_v54  ;;  %vm914_vm8 = vweird.f32 %v907_v54  ;;  %v920_v63 = vand.u32 2147483648, %v907_v54  ;;  %v918_v2 = vand.u32 2147483647, %v907_v54 }
 0xe6c   :  { %v921_v1 = vor.u32 1.1754944e-38, %v920_v63  ;;  %vm919_vm15 = vcmp.eq.f32.partialorder %v918_v2, 8.507059e+37 }
 0xe70   :  { %v1551_v59 = vpop.eup %1550 }
 0xe71   :  { %v910_v60 = vmul.f32 %v1551_v59, %v907_v54  ;;  %vm915_vm12 = vweird.f32 %v1551_v59  ;;  %v1021_v54 = vpop.permute.xlu1 %1020 }
 0xe72   :  { %vm916_vm14 = vmor %vm914_vm8, %vm915_vm12  ;;  %v1034_v57 = vsel %vm1033_vm0, %v1032_v56, %v1021_v54  ;;  %vm1053_vm8 = vcmask 130048  }
 0xe73   :  { %v911_v61 = vsub.f32 1.0, %v910_v60 }
 0xe75   :  { %v912_v62 = vmul.f32 %v1551_v59, %v911_v61 }
 0xe77   :  { %v913_v0 = vadd.f32 %v1551_v59, %v912_v62 }
 0xe79   :  { %v917_v4 = vsel %vm916_vm14, %v1551_v59, %v913_v0  ;;  %v1030_v63 = vpop.permute.xlu1 %1029 }
 0xe7a   :  { %v922_v6 = vsel %vm919_vm15, %v921_v1, %v917_v4 }
 0xe9a   :  { %v878_v5 = vpop.f32.mrf.mxu2 }
 0xe9b   :  { %v2371_v7 = vmul.f32 %v922_v6, %v878_v5  ;;  %v1129_v6 = vld [vmem:[%s2640_s6 + $0x398] sm:$0xff] }
 0xe9c   :  { %1143 = vmatpush.msrb.mxu0 %v1129_v6 }
 0xe9d   :  { %v925_v9 = vrot.slane %v2371_v7, 6  ;;  %v927_v10 = vrot.slane %v2371_v7, 4  ;;  %v929_v13 = vrot.slane %v2371_v7, 2 }
 0xe9f   :  { %v931_v8 = vsel %vm154_vm9, %v2371_v7, %v925_v9  ;;  %v1398_v16 = vsel %vm824_vm13, %v2134_v15, %v929_v13  ;;  %v1513_v15 = vld [vmem:[%s2641_s7 + $0x28] ss:$0 sm:$0xff]  ;;  %vm997_vm9 = vcmp.gt.f32.partialorder %v995_v35, 0.5  ;;  %v1299_v9 = vld [vmem:[%s2640_s6 + $0x478] sm:$0xff] }
 0xea0   :  { %v932_v17 = vsel %vm156_vm10, %v931_v8, %v927_v10  ;;  %1399 = vst.msk [vmem:[#allocation6] sm:$0xff] %vm70_vm1, %v1398_v16  ;;  %vm998_vm10 = vcmp.gt.f32.partialorder %v996_v11, 0.5  ;;  %v1298_v10 = vld [vmem:[%s2640_s6 + $0x470] sm:$0xff]  ;;  %1310 = vmatpush.msrb.mxu1 %v1299_v9  ;;  %v1189_v8 = vld [vmem:[%s2640_s6 + $0x3c8] sm:$0xff] }
 0xea1   :  { %v933_v18 = vsel %vm824_vm13, %v932_v17, %v929_v13  ;;  %vm1001_vm13 = vcmask 7168   ;;  %v1127_v13 = vld [vmem:[%s2640_s6 + $0x388] sm:$0xff]  ;;  %v1126_v17 = vld [vmem:[%s2640_s6 + $0x380] sm:$0xff] }
 0xea2   :  { %v942_v19 = vsel %vm70_vm1, %v933_v18, %v937_v3  ;;  %v943_v21 = vsel %vm70_vm1, %v933_v18, %v939_v20  ;;  %v1191_v3 = vld [vmem:[%s2640_s6 + $0x3d8] sm:$0xff]  ;;  %v1297_v16 = vld [vmem:[%s2640_s6 + $0x468] sm:$0xff]  ;;  %1311 = vmatpush.msrb.mxu1 %v1298_v10  ;;  %v1188_v18 = vld [vmem:[%s2640_s6 + $0x3c0] sm:$0xff] }
 0xea3   :  { %1457 = vmatmul.msk.f32.vlgmr.msra.gmra.mxu1 %vm72_vm2, %v942_v19  ;;  %v1296_v19 = vld [vmem:[%s2640_s6 + $0x460] sm:$0xff]  ;;  %v1125_v20 = vld [vmem:[%s2640_s6 + $0x378] sm:$0xff] }
 0xea4   :  { %1312 = vmatpush.msrb.mxu1 %v1297_v16 }
 0xea6   :  { %1313 = vmatpush.msrb.mxu1 %v1296_v19  ;;  %v1226_v19 = vld [vmem:[%s2640_s6 + $0x3f0] sm:$0xff] }
 0xeab   :  { %1458 = vmatmul.msk.f32.gmra.mxu1 %vm72_vm2, %v943_v21  ;;  %v1187_v21 = vld [vmem:[%s2640_s6 + $0x3b8] sm:$0xff] }
 0xf20   :  { %v977_v22 = vpop.f32.mrf.mxu1 }
 0xf21   :  { %v978_v23 = vadd.f32 %v1513_v15, %v977_v22  ;;  %v1124_v22 = vld [vmem:[%s2640_s6 + $0x370] sm:$0xff] }
 0xf23   :  { %1552 = vtanh.f32 %v978_v23  ;;  %v1186_v23 = vld [vmem:[%s2640_s6 + $0x3b0] sm:$0xff] }
 0xf28   :  { %v980_v25 = vpop.f32.mrf.mxu1 }
 0xf29   :  { %v1553_v26 = vpop.eup %1552  ;;  %v981_v27 = vadd.f32 %v1513_v15, %v980_v25  ;;  %v1295_v15 = vld [vmem:[%s2640_s6 + $0x458] sm:$0xff]  ;;  %v1123_v25 = vld [vmem:[%s2640_s6 + $0x368] sm:$0xff] }
 0xf2a   :  { %v987_v28 = vmul.f32 %v1553_v26, %v1514_v24  ;;  %1314 = vmatpush.msrb.mxu1 %v1295_v15  ;;  %v1185_v26 = vld [vmem:[%s2640_s6 + $0x3a8] sm:$0xff] }
 0xf2b   :  { %1554 = vtanh.f32 %v981_v27  ;;  %v1293_v27 = vld [vmem:[%s2640_s6 + $0x448] sm:$0xff] }
 0xf2c   :  { %v989_v12 = vsel %vm70_vm1, %v987_v28, 0.0 }
 0xf2d   :  { %990 = vadd.xlane.f32.xlu0 %v989_v12 }
 0xf31   :  { %v1555_v30 = vpop.eup %1554 }
 0xf32   :  { %v988_v31 = vmul.f32 %v1555_v30, %v1514_v24  ;;  %v1294_v24 = vld [vmem:[%s2640_s6 + $0x450] sm:$0xff] }
 0xf33   :  { %1315 = vmatpush.msrb.mxu1 %v1294_v24 }
 0xf34   :  { %v992_v34 = vsel %vm70_vm1, %v988_v31, 0.0 }
 0xf35   :  { %993 = vadd.xlane.f32.xlu2 %v992_v34  ;;  %1316 = vmatpush.msrb.mxu1 %v1293_v27 }
 0xf41   :  { %1023 = vrot.lane.b32.xlu0 %v2304_v14, %s1645_s1  ;;  %s1405_s1 = sshll.u32 %s1648_s14, 4  ;;  %s1406_s1 = int_to_ptr.vmem [resolvable:$true] %s1405_s1 }
 0xf4d   :  { %1026 = vrot.lane.b32.xlu2 %v2304_v14, %s1646_s17 }
 0xfa0   :  { %v991_v37 = vpop.xlane.xlu0 %990 }
 0xfa1   :  { %v999_v38 = vsel %vm997_vm9, -1e+12, %v991_v37 }
 0xfa2   :  { %v1002_v41 = vsel %vm1001_vm13, %v999_v38, -inf }
 0xfa8   :  { %v994_v39 = vpop.xlane.xlu2 %993 }
 0xfa9   :  { %v1000_v40 = vsel %vm998_vm10, -1e+12, %v994_v39 }
 0xfaa   :  { %v1003_v42 = vsel %vm1001_vm13, %v1000_v40, -inf }
 0xfab   :  { %v1004_v43 = vmax.f32 %v1002_v41, %v1003_v42 }
 0xfad   :  { %v1005_v44 = vrot.slane %v1004_v43, 4 }
 0xfaf   :  { %v1006_v14 = vmax.f32 %v1004_v43, %v1005_v44  ;;  %v1122_v43 = vld [vmem:[%s2640_s6 + $0x360] sm:$0xff] }
 0xfb0   :  { %v1027_v59 = vpop.permute.xlu2 %1026  ;;  %v1184_v44 = vld [vmem:[%s2640_s6 + $0x3a0] sm:$0xff] }
 0xfb1   :  { %v1007_v45 = vrot.slane %v1006_v14, 2 }
 0xfb3   :  { %v1008_v47 = vmax.f32 %v1006_v14, %v1007_v45  ;;  %v1024_v55 = vpop.permute.xlu0 %1023  ;;  %v1292_v14 = vld [vmem:[%s2640_s6 + $0x440] sm:$0xff] }
 0xfb4   :  { %v1036_v58 = vsel %vm1035_vm11, %v1034_v57, %v1024_v55  ;;  %1317 = vmatpush.msrb.mxu1 %v1292_v14 }
 0xfb5   :  { %v1009_v48 = vrot.slane %v1008_v47, 1  ;;  %v1038_v62 = vsel %vm1037_vm6, %v1036_v58, %v1027_v59 }
 0xfb6   :  { %v1040_v0 = vsel %vm1039_vm7, %v1038_v62, %v1030_v63  ;;  %v1233_v62 = vld [vmem:[%s2640_s6 + $0x428] sm:$0xff]  ;;  %v1232_v63 = vld [vmem:[%s2640_s6 + $0x420] sm:$0xff] }
 0xfb7   :  { %v1010_v49 = vmax.f32 %v1008_v47, %v1009_v48  ;;  %v1515_v47 = vld [vmem:[%s2641_s7 + $0x19] ss:$0 sm:$0xff] }
 0xfb9   :  { %v1011_v50 = vsub.f32 %v999_v38, %v1010_v49  ;;  %v1012_v51 = vsub.f32 %v1000_v40, %v1010_v49 }
 0xfbb   :  { %v1013_v52 = vmul.f32 1.442695, %v1011_v50  ;;  %v1015_v53 = vmul.f32 1.442695, %v1012_v51 }
 0xfbd   :  { %1556 = vpow2.f32 %v1013_v52 }
 0xfbe   :  { %1558 = vpow2.f32 %v1015_v53 }
 0xfc3   :  { %v1557_v60 = vpop.eup %1556 }
 0xfc4   :  { %v1559_v61 = vpop.eup %1558  ;;  %1043 = vperm.xlu0 %1483, %v1557_v60  }
 0xfc5   :  { %1048 = vperm.xlu1 %1482, %v1559_v61   ;;  %1091 = vmatpush.msrb.mxu3 %v1559_v61  ;;  %v1234_v61 = vld [vmem:[%s2640_s6 + $0x430] sm:$0xff] }
 0xfc7   :  { %1092 = vmatpush.msrb.mxu3 %v1557_v60  ;;  %v1235_v60 = vld [vmem:[%s2640_s6 + $0x438] sm:$0xff] }
 0xfc8   :  { %1460 = vmatmul.msk.f32.vlgmr.msrb.gmra.mxu3 %vm1053_vm8, %v1040_v0 }
 0xfc9   :  { %1245 = vmatpush.msra.mxu3 %v1235_v60 }
 0xfcb   :  { %1246 = vmatpush.msra.mxu3 %v1234_v61  ;;  %v1521_v61 = vld [vmem:[%s2641_s7 + $0x20] ss:$0 sm:$0xff] }
 0xfcd   :  { %1247 = vmatpush.msra.mxu3 %v1233_v62 }
 0xfcf   :  { %1248 = vmatpush.msra.mxu3 %v1232_v63 }
0x1036   :  { %v1044_v2 = vpop.permute.xlu0 %1043 }
0x1037   :  { %v1049_v1 = vpop.permute.xlu1 %1048  ;;  %v1051_v4 = vmul.f32 %v1044_v2, %v2326_v32  ;;  %v1128_v32 = vld [vmem:[%s2640_s6 + $0x390] sm:$0xff]  ;;  %v1231_v2 = vld [vmem:[%s2640_s6 + $0x418] sm:$0xff] }
0x1038   :  { %v1052_v29 = vmul.f32 %v1049_v1, %v2333_v36  ;;  %v1190_v36 = vld [vmem:[%s2640_s6 + $0x3d0] sm:$0xff]  ;;  %1144 = vmatpush.msrb.mxu0 %v1128_v32  ;;  %1249 = vmatpush.msra.mxu3 %v1231_v2  ;;  %v1518_v32 = vld [vmem:[%s2641_s7 + $0x1c] ss:$0 sm:$0xff] }
0x103a   :  { %1071 = vmatpush.msrb.mxu2 %v1052_v29  ;;  %1145 = vmatpush.msrb.mxu0 %v1127_v13  ;;  %v1230_v29 = vld [vmem:[%s2640_s6 + $0x410] sm:$0xff]  ;;  %v1519_v13 = vld [vmem:[%s2641_s7 + $0x1d] ss:$0 sm:$0xff] }
0x103b   :  { %1250 = vmatpush.msra.mxu3 %v1230_v29  ;;  %v1329_v29 = vld [vmem:[%s2640_s6 + $0x480] sm:$0xff] }
0x103c   :  { %1072 = vmatpush.msrb.mxu2 %v1051_v4  ;;  %1146 = vmatpush.msrb.mxu0 %v1126_v17  ;;  %v1228_v17 = vld [vmem:[%s2640_s6 + $0x400] sm:$0xff] }
0x103d   :  { %1459 = vmatmul.msk.f32.vlgmr.msrb.gmra.mxu2 %vm1053_vm8, %v1040_v0 }
0x103e   :  { %1202 = vmatpush.msra.mxu2 %v1191_v3  ;;  %1147 = vmatpush.msrb.mxu0 %v1125_v20  ;;  %v1225_v20 = vld [vmem:[%s2640_s6 + $0x3e8] sm:$0xff] }
0x1040   :  { %1203 = vmatpush.msra.mxu2 %v1190_v36  ;;  %1148 = vmatpush.msrb.mxu0 %v1124_v22 }
0x1042   :  { %1204 = vmatpush.msra.mxu2 %v1189_v8  ;;  %1149 = vmatpush.msrb.mxu0 %v1123_v25 }
0x1044   :  { %1205 = vmatpush.msra.mxu2 %v1188_v18  ;;  %1150 = vmatpush.msrb.mxu0 %v1122_v43  ;;  %v1227_v18 = vld [vmem:[%s2640_s6 + $0x3f8] sm:$0xff]  ;;  %v1339_v43 = vld [vmem:[%s2640_s6 + $0x4d0] sm:$0xff] }
0x1046   :  { %1206 = vmatpush.msra.mxu2 %v1187_v21  ;;  %v1517_v21 = vld [vmem:[%s2641_s7 + $0x1a] ss:$0 sm:$0xff] }
0x1048   :  { %1207 = vmatpush.msra.mxu2 %v1186_v23 }
0x104a   :  { %1208 = vmatpush.msra.mxu2 %v1185_v26 }
0x104b   :  { %v1094_v5 = vpop.f32.mrf.mxu3 }
0x104c   :  { %1099 = vperm.xlu1 %1482, %v1094_v5   ;;  %1209 = vmatpush.msra.mxu2 %v1184_v44  ;;  %v1229_v5 = vld [vmem:[%s2640_s6 + $0x408] sm:$0xff] }
0x104d   :  { %1251 = vmatpush.msra.mxu3 %v1229_v5  ;;  %v1338_v44 = vld [vmem:[%s2640_s6 + $0x4c8] sm:$0xff] }
0x104f   :  { %1252 = vmatpush.msra.mxu3 %v1228_v17 }
0x1051   :  { %1253 = vmatpush.msra.mxu3 %v1227_v18 }
0x1053   :  { %1254 = vmatpush.msra.mxu3 %v1226_v19 }
0x1055   :  { %1255 = vmatpush.msra.mxu3 %v1225_v20 }
0x10be   :  { %v1100_v28 = vpop.permute.xlu1 %1099 }
0x10bf   :  { %1560 = vrcp.f32 %v1100_v28  ;;  %v1113_v34 = vand.u32 2147483648, %v1100_v28  ;;  %v1111_v11 = vand.u32 2147483647, %v1100_v28  ;;  %vm1107_vm12 = vweird.f32 %v1100_v28 }
0x10c0   :  { %v1074_v40 = vpop.f32.mrf.mxu2 }
0x10c1   :  { %v1114_v38 = vor.u32 1.1754944e-38, %v1113_v34  ;;  %vm1112_vm15 = vcmp.eq.f32.partialorder %v1111_v11, 8.507059e+37 }
0x10c5   :  { %v1561_v12 = vpop.eup %1560 }
0x10c6   :  { %v1103_v30 = vmul.f32 %v1561_v12, %v1100_v28  ;;  %vm1108_vm5 = vweird.f32 %v1561_v12  ;;  %v1520_v28 = vld [vmem:[%s2641_s7 + $0x1b] ss:$0 sm:$0xff] }
0x10c7   :  { %vm1109_vm14 = vmor %vm1107_vm12, %vm1108_vm5 }
0x10c8   :  { %v1104_v31 = vsub.f32 1.0, %v1103_v30 }
0x10ca   :  { %v1105_v35 = vmul.f32 %v1561_v12, %v1104_v31 }
0x10cc   :  { %v1106_v37 = vadd.f32 %v1561_v12, %v1105_v35 }
0x10ce   :  { %v1110_v39 = vsel %vm1109_vm14, %v1561_v12, %v1106_v37 }
0x10cf   :  { %v1115_v41 = vsel %vm1112_vm15, %v1114_v38, %v1110_v39 }
0x10d0   :  { %v1116_v42 = vmul.f32 %v1115_v41, %v1074_v40 }
0x10d2   :  { %1118 = vrot.lane.b32.xlu2 %v1116_v42, %s1635_s16  ;;  %v1340_v42 = vld [vmem:[%s2640_s6 + $0x4d8] sm:$0xff] }
0x10d3   :  { %1350 = vmatpush.msra.mxu0 %v1340_v42 }
0x10d5   :  { %1351 = vmatpush.msra.mxu0 %v1339_v43 }
0x10d7   :  { %1352 = vmatpush.msra.mxu0 %v1338_v44 }
0x112c   :  { %v1119_v45 = vpop.permute.xlu2 %1118 }
0x112d   :  { %v1121_v46 = vsel %vm70_vm1, %v2371_v7, %v1119_v45 }
0x112e   :  { %1461 = vmatmul.msk.f32.vlgmr.msrb.gmra.mxu0 %vm72_vm2, %v1121_v46  ;;  %1462 = vmatmul.msk.f32.vlgmr.msra.gmra.mxu2 %vm72_vm2, %v1121_v46 }
0x112f   :  { %1464 = vmatmul.msk.f32.vlgmr.msrb.gmra.mxu1 %vm72_vm2, %v1121_v46  ;;  %v1337_v46 = vld [vmem:[%s2640_s6 + $0x4c0] sm:$0xff] }
0x1130   :  { %1353 = vmatpush.msra.mxu0 %v1337_v46 }
0x11ab   :  { %v1152_v48 = vpop.f32.mrf.mxu0 }
0x11ac   :  { %v1153_v49 = vadd.f32 %v1515_v47, %v1152_v48  ;;  %v1336_v48 = vld [vmem:[%s2640_s6 + $0x4b8] sm:$0xff]  ;;  %v1319_v5 = vpop.f32.mrf.mxu1 }
0x11ad   :  { %1354 = vmatpush.msra.mxu0 %v1336_v48 }
0x11ae   :  { %v2489_v50 = vmax.f32 %v1153_v49, 0.0  ;;  %v1335_v49 = vld [vmem:[%s2640_s6 + $0x4b0] sm:$0xff] }
0x11af   :  { %1355 = vmatpush.msra.mxu0 %v1335_v49 }
0x11b0   :  { %v1158_v51 = vsel %vm115_vm4, %v2489_v50, 0.0 }
0x11b1   :  { %1159 = vadd.xlane.f32.xlu1 %v1158_v51  ;;  %v1211_v15 = vpop.f32.mrf.mxu2  ;;  %v1333_v51 = vld [vmem:[%s2640_s6 + $0x4a0] sm:$0xff] }
0x11b2   :  { %v1212_v23 = vadd.f32 %v1517_v21, %v1211_v15 }
0x11b4   :  { %v1214_v24 = vmax.f32 %v1212_v23, 0.0 }
0x1224   :  { %v1160_v52 = vpop.xlane.xlu1 %1159 }
0x1225   :  { %v1161_v53 = vmul.f32 %v1160_v52, %v1763_v33 }
0x1227   :  { %v1162_v54 = vsub.f32 %v2489_v50, %v1161_v53  ;;  %v1332_v53 = vld [vmem:[%s2640_s6 + $0x498] sm:$0xff] }
0x1229   :  { %v1163_v55 = vmul.f32 %v1162_v54, %v1162_v54 }
0x122b   :  { %v1164_v56 = vsel %vm115_vm4, %v1163_v55, 0.0  ;;  %v1331_v55 = vld [vmem:[%s2640_s6 + $0x490] sm:$0xff] }
0x122c   :  { %1165 = vadd.xlane.f32.xlu2 %v1164_v56 }
0x129f   :  { %v1166_v57 = vpop.xlane.xlu2 %1165 }
0x12a0   :  { %v1167_v58 = vmul.f32 %v1166_v57, %v1763_v33  ;;  %v1330_v57 = vld [vmem:[%s2640_s6 + $0x488] sm:$0xff] }
0x12a2   :  { %v1168_v59 = vadd.f32 1e-05, %v1167_v58 }
0x12a4   :  { %1562 = vrsqrt.f32 %v1168_v59  ;;  %vm1175_vm10 = vweird.f32 %v1168_v59 }
0x12aa   :  { %v1563_v0 = vpop.eup %1562 }
0x12ab   :  { %v1170_v1 = vmul.f32 %v1563_v0, %v1168_v59  ;;  %vm1176_vm9 = vweird.f32 %v1563_v0 }
0x12ac   :  { %vm1177_vm13 = vmor %vm1175_vm10, %vm1176_vm9 }
0x12ad   :  { %v1171_v4 = vmul.f32 %v1563_v0, %v1170_v1 }
0x12af   :  { %v1172_v6 = vmul.f32 0.5, %v1171_v4  ;;  %v1516_v4 = vld [vmem:[%s2641_s7 + $0x1e] ss:$0 sm:$0xff] }
0x12b1   :  { %v1173_v3 = vsub.f32 1.5, %v1172_v6  ;;  %v1320_v6 = vadd.f32 %v1516_v4, %v1319_v5 }
0x12b3   :  { %v1174_v9 = vmul.f32 %v1563_v0, %v1173_v3  ;;  %v1322_v3 = vmax.f32 %v1320_v6, 0.0 }
0x12b5   :  { %v1178_v36 = vsel %vm1177_vm13, %v1563_v0, %v1174_v9  ;;  %v1522_v0 = vld [vmem:[%s2641_s7 + $0x21] ss:$0 sm:$0xff] }
0x12b6   :  { %v1179_v10 = vmul.f32 %v1178_v36, %v1162_v54 }
0x12b8   :  { %v1181_v8 = vmul.f32 %v1518_v32, %v1179_v10  ;;  %v1523_v10 = vld [vmem:[%s2641_s7 + $0x1f] ss:$0 sm:$0xff] }
0x12ba   :  { %v1183_v16 = vadd.f32 %v1519_v13, %v1181_v8 }
0x12bc   :  { %1216 = vrot.lane.b32.xlu0 %v1183_v16, %s1635_s16 }
0x12c4   :  { %1219 = vrot.lane.b32.xlu0 %v2371_v7, %s1636_s15  ;;  %v1224_v7 = vld [vmem:[%s2640_s6 + $0x3e0] sm:$0xff] }
0x12c5   :  { %1256 = vmatpush.msra.mxu3 %v1224_v7 }
0x132e   :  { %v1217_v22 = vpop.permute.xlu0 %1216 }
0x132f   :  { %v1222_v25 = vsel %vm70_vm1, %v1214_v24, %v1217_v22 }
0x1336   :  { %v2546_v26 = vpop.permute.xlu0 %1219 }
0x1337   :  { %v1223_v27 = vsel %vm72_vm2, %v1222_v25, %v2546_v26 }
0x1338   :  { %1463 = vmatmul.msk.f32.vlgmr.msra.gmra.mxu3 %vm88_vm3, %v1223_v27 }
0x13bb   :  { %v1258_v12 = vpop.f32.mrf.mxu3 }
0x13bc   :  { %v1259_v30 = vadd.f32 %v1520_v28, %v1258_v12 }
0x13be   :  { %v1261_v31 = vmax.f32 %v1259_v30, 0.0 }
0x13c0   :  { %v1262_v34 = vmul.f32 %v1261_v31, %v1214_v24 }
0x13c2   :  { %v2555_v35 = vsub.f32 %v2489_v50, %v1262_v34  ;;  %v1334_v50 = vld [vmem:[%s2640_s6 + $0x4a8] sm:$0xff]  ;;  %s1647_s6 = smov [#allocation6]   ;;  %v1524_v34 = vld [vmem:[%s2641_s7 + $0x22] ss:$0 sm:$0xff] }
0x13c3   :  { %1356 = vmatpush.msra.mxu0 %v1334_v50  ;;  %s1416_s28 = sshll.u32 %s1647_s6, 4  ;;  %s1417_s28 = int_to_ptr.vmem [resolvable:$true] %s1416_s28 }
0x13c4   :  { %v1266_v11 = vsel %vm115_vm4, %v2555_v35, 0.0  ;;  %1421 = dma.vmem_to_hbm [thread:$0]  %s1417_s28, 128, %s1419_s10, [#allocation7]  }
0x13c5   :  { %1267 = vadd.xlane.f32.xlu0 %v1266_v11  ;;  %1357 = vmatpush.msra.mxu0 %v1333_v51 }
0x13c7   :  { %1358 = vmatpush.msra.mxu0 %v1332_v53 }
0x13c9   :  { %1359 = vmatpush.msra.mxu0 %v1331_v55 }
0x13cb   :  { %1360 = vmatpush.msra.mxu0 %v1330_v57 }
0x13cd   :  { %1361 = vmatpush.msra.mxu0 %v1329_v29 }
0x1438   :  { %v1268_v37 = vpop.xlane.xlu0 %1267 }
0x1439   :  { %v1269_v38 = vmul.f32 %v1268_v37, %v1763_v33 }
0x143b   :  { %v1270_v39 = vsub.f32 %v2555_v35, %v1269_v38 }
0x143d   :  { %v1271_v40 = vmul.f32 %v1270_v39, %v1270_v39 }
0x143f   :  { %v1272_v41 = vsel %vm115_vm4, %v1271_v40, 0.0 }
0x1440   :  { %1273 = vadd.xlane.f32.xlu1 %v1272_v41 }
0x14b3   :  { %v1274_v14 = vpop.xlane.xlu1 %1273 }
0x14b4   :  { %v1275_v45 = vmul.f32 %v1274_v14, %v1763_v33 }
0x14b6   :  { %v1276_v47 = vadd.f32 1e-05, %v1275_v45 }
0x14b8   :  { %1564 = vrsqrt.f32 %v1276_v47  ;;  %vm1283_vm11 = vweird.f32 %v1276_v47 }
0x14be   :  { %v1565_v52 = vpop.eup %1564 }
0x14bf   :  { %v1278_v54 = vmul.f32 %v1565_v52, %v1276_v47  ;;  %vm1284_vm0 = vweird.f32 %v1565_v52 }
0x14c0   :  { %vm1285_vm6 = vmor %vm1283_vm11, %vm1284_vm0 }
0x14c1   :  { %v1279_v56 = vmul.f32 %v1565_v52, %v1278_v54 }
0x14c3   :  { %v1280_v58 = vmul.f32 0.5, %v1279_v56 }
0x14c5   :  { %v1281_v59 = vsub.f32 1.5, %v1280_v58 }
0x14c7   :  { %v1282_v60 = vmul.f32 %v1565_v52, %v1281_v59 }
0x14c9   :  { %v1286_v62 = vsel %vm1285_vm6, %v1565_v52, %v1282_v60 }
0x14ca   :  { %v1287_v63 = vmul.f32 %v1286_v62, %v1270_v39 }
0x14cc   :  { %v1289_v2 = vmul.f32 %v1521_v61, %v1287_v63 }
0x14ce   :  { %v1291_v1 = vadd.f32 %v1522_v0, %v1289_v2 }
0x14d0   :  { %1324 = vrot.lane.b32.xlu2 %v1291_v1, %s1635_s16 }
0x152a   :  { %v1325_v9 = vpop.permute.xlu2 %1324 }
0x152b   :  { %v1327_v32 = vsel %vm70_vm1, %v1322_v3, %v1325_v9 }
0x152c   :  { %v1328_v36 = vsel %vm72_vm2, %v1327_v32, %v2546_v26 }
0x152d   :  { %1465 = vmatmul.msk.f32.vlgmr.msra.gmra.mxu0 %vm88_vm3, %v1328_v36 }
0x15aa   :  { %v1363_v13 = vpop.f32.mrf.mxu0 }
0x15ab   :  { %v1364_v8 = vadd.f32 %v1523_v10, %v1363_v13 }
0x15ad   :  { %v1366_v16 = vmax.f32 %v1364_v8, 0.0 }
0x15af   :  { %v1367_v17 = vmul.f32 %v1366_v16, %v1322_v3 }
0x15b1   :  { %v1368_v18 = vsub.f32 %v2555_v35, %v1367_v17 }
0x15b3   :  { %v1371_v19 = vsel %vm115_vm4, %v1368_v18, 0.0 }
0x15b4   :  { %1372 = vadd.xlane.f32.xlu1 %v1371_v19 }
0x1627   :  { %v1373_v20 = vpop.xlane.xlu1 %1372 }
0x1628   :  { %v1374_v7 = vmul.f32 %v1373_v20, %v1763_v33 }
0x162a   :  { %v1375_v21 = vsub.f32 %v1368_v18, %v1374_v7 }
0x162c   :  { %v1376_v15 = vmul.f32 %v1375_v21, %v1375_v21 }
0x162e   :  { %v1377_v22 = vsel %vm115_vm4, %v1376_v15, 0.0 }
0x162f   :  { %1378 = vadd.xlane.f32.xlu1 %v1377_v22 }
0x16a2   :  { %v1379_v23 = vpop.xlane.xlu1 %1378 }
0x16a3   :  { %v1380_v24 = vmul.f32 %v1379_v23, %v1763_v33  ;;  %v1525_v33 = vld [vmem:[%s2641_s7 + $0x23] ss:$0 sm:$0xff] }
0x16a5   :  { %v1381_v25 = vadd.f32 1e-05, %v1380_v24 }
0x16a7   :  { %1566 = vrsqrt.f32 %v1381_v25  ;;  %vm1388_vm2 = vweird.f32 %v1381_v25 }
0x16ad   :  { %v1567_v26 = vpop.eup %1566 }
0x16ae   :  { %v1383_v27 = vmul.f32 %v1567_v26, %v1381_v25  ;;  %vm1389_vm1 = vweird.f32 %v1567_v26 }
0x16af   :  { %vm1390_vm3 = vmor %vm1388_vm2, %vm1389_vm1 }
0x16b0   :  { %v1384_v28 = vmul.f32 %v1567_v26, %v1383_v27 }
0x16b2   :  { %v1385_v12 = vmul.f32 0.5, %v1384_v28 }
0x16b4   :  { %v1386_v30 = vsub.f32 1.5, %v1385_v12 }
0x16b6   :  { %v1387_v31 = vmul.f32 %v1567_v26, %v1386_v30 }
0x16b8   :  { %v1391_v35 = vsel %vm1390_vm3, %v1567_v26, %v1387_v31 }
0x16b9   :  { %v1392_v11 = vmul.f32 %v1391_v35, %v1375_v21 }
0x16bb   :  { %v1394_v37 = vmul.f32 %v1524_v34, %v1392_v11 }
0x16bd   :  { %v1396_v38 = vadd.f32 %v1525_v33, %v1394_v37 }
0x16bf   :  { %1397 = vst.msk [vmem:[#allocation5] sm:$0x3] %vm115_vm4, %v1396_v38 }
0x16c0   :  { %1410 = dma.vmem_to_hbm [thread:$0]  %s1406_s1, 32, %s1408_s18, [#allocation3]  }
0x16c1   :  { %1630 = dma.done.wait [#allocation3], 32  }
0x16c2   :  { %1631 = vsyncadd [#allocation3], 4294967264 }
0x16c3   :  { %1632 = dma.done.wait [#allocation7], 128  }
0x16c4   :  { %1633 = vsyncadd [#allocation7], 4294967168 }
0x16c5   :  { %1430 = vsyncpa [#allocation3], 1 }
0x16c6   :  { %1431 = vsyncpa [#allocation7], 1 }
0x16c7   :  { %1432 = vsyncpa [#allocation4], 1 }

</bundles_post_ra>
